<compile_context>
chip_gen: v6e
topology: v6e:2x2x1
jax: 0.10.0
libtpu: 0.0.40
codegen_flags: <defaults>
</compile_context>

<pallas_src>
import jax
import jax.numpy as jnp
from jax.experimental import pallas as pl
from jax.experimental.pallas import tpu as pltpu

BN_EPS = 1e-5


def _make_kernel(C):
    """Kernel processing one batch-block per grid step.

    x_ref : (C, bn_blk, HW)   raw image pixels (channel-major, HW on the lane axis)
    p_ref : (F, C+3)          [ W'^T | b' | bn_scale'(=scale/HW) | bn_shift ]  (all folds precomputed)
    o_ref : (1, F, bn_blk)    bn_features block (feature dim on sublanes; transposed in wrapper)
    """
    def kernel(x_ref, p_ref, o_ref):
        p = p_ref[...]                                     # (F, C+3)
        x = x_ref[...].astype(jnp.float32)                 # (C, bn_blk, HW); cast after load

        # 1x1-conv as C unrolled VPU broadcast-FMAs over the whole (F, bn_blk, HW) slab.
        # K = C = 4 is far too small for the MXU; each parameter column is broadcast exactly
        # once per grid step (no per-image re-broadcast).
        h = p[:, 0:1][..., None] * x[0:1]                  # (F, bn_blk, HW)
        for c in range(1, C):
            h = h + p[:, c:c + 1][..., None] * x[c:c + 1]

        bias = p[:, C:C + 1][..., None]                    # (F, 1, 1) conv bias w/ pixel-norm fold
        h = jnp.maximum(h + bias, 0.0)                     # bias + ReLU

        pooled = jnp.sum(h, axis=-1)                       # GAP -> (F, bn_blk); one XLU lane reduce
        scale = p[:, C + 1:C + 2]                          # (F, 1) BNneck scale with 1/HW folded in
        shift = p[:, C + 2:C + 3]                          # (F, 1) BNneck shift
        o_ref[0, :, :] = pooled * scale + shift            # ONE dense (F, bn_blk) store per step

    return kernel


def metalearning_forward(images_nchw, pixel_mean, pixel_std,
                         w_proj, b_proj, bn_gamma, bn_beta, bn_rmean, bn_rvar):
    """Eval-mode forward of Metalearning. Returns bn_features of shape (N, F)."""
    N, C, H, W = images_nchw.shape
    F = w_proj.shape[1]
    HW = H * W

    # ---- fold pixel normalization into the projection (exact: ReLU comes after the linear map)
    inv_std = 1.0 / pixel_std.astype(jnp.float32)
    w32 = w_proj.astype(jnp.float32)
    w_fold = w32 * inv_std[:, None]                                            # (C, F)
    b_fold = b_proj.astype(jnp.float32) - (pixel_mean.astype(jnp.float32) * inv_std) @ w32

    # ---- fold inference-mode BN into a scale/shift pair; fold GAP's 1/HW into the scale
    bn_scale = bn_gamma.astype(jnp.float32) / jnp.sqrt(bn_rvar.astype(jnp.float32) + BN_EPS)
    bn_shift = bn_beta.astype(jnp.float32) - bn_rmean.astype(jnp.float32) * bn_scale
    scale_fold = bn_scale * jnp.float32(1.0 / HW)

    # single (F, C+3) parameter slab: one VMEM buffer / one DMA instead of seven
    params = jnp.concatenate(
        [w_fold.T, b_fold[:, None], scale_fold[:, None], bn_shift[:, None]], axis=1)

    # NCHW -> (C, N, HW): channel-major so the kernel sees a dense (C, bn_blk, HW) block with
    # HW on the lane axis.  This transpose is on a tiny array (a few hundred KiB at most).
    x = jnp.transpose(images_nchw, (1, 0, 2, 3)).reshape(C, N, HW)

    # Batch-block the grid: whole batch in one step for small N, otherwise 8-aligned blocks of
    # up to 128 images (lane-dense output store; n_blocks >= 2 for large N feeds both v7x TCs).
    if N <= 8:
        bn_blk = N
    else:
        bn_blk = min(128, ((N + 7) // 8) * 8)
    n_blocks = pl.cdiv(N, bn_blk)
    n_pad = n_blocks * bn_blk
    if n_pad != N:
        x = jnp.pad(x, ((0, 0), (0, n_pad - N), (0, 0)))

    kernel = _make_kernel(C)

    out = pl.pallas_call(
        kernel,
        out_shape=jax.ShapeDtypeStruct((n_blocks, F, bn_blk), jnp.float32),
        grid_spec=pltpu.PrefetchScalarGridSpec(
            num_scalar_prefetch=0,
            grid=(n_blocks,),
            in_specs=[
                pl.BlockSpec((C, bn_blk, HW), lambda i: (0, i, 0)),   # image batch-block
                pl.BlockSpec((F, C + 3), lambda i: (0, 0)),           # folded params (resident)
            ],
            out_specs=pl.BlockSpec((1, F, bn_blk), lambda i: (i, 0, 0)),
        ),
        compiler_params=pltpu.CompilerParams(
            dimension_semantics=("parallel",),
            vmem_limit_bytes=32 * 1024 * 1024,
        ),
    )(x, params)

    # (n_blocks, F, bn_blk) -> (N, F): tiny glue on a few-KB result.
    out = jnp.transpose(out, (0, 2, 1)).reshape(n_pad, F)[:N]
    return out


def _reference_forward(images_nchw, pixel_mean, pixel_std,
                       w_proj, b_proj, bn_gamma, bn_beta, bn_rmean, bn_rvar):
    """Pure-JAX reference (mirrors the PyTorch semantics, unfolded)."""
    N, C, H, W = images_nchw.shape
    mean = pixel_mean.reshape(1, C, 1, 1)
    std = pixel_std.reshape(1, C, 1, 1)
    x = (images_nchw - mean) / std                                     # preprocess_image
    x = jnp.transpose(x, (0, 2, 3, 1)).reshape(N, H * W, C)
    h = jnp.maximum(jnp.einsum('npc,cf->npf', x, w_proj) + b_proj, 0)  # backbone
    pooled = jnp.mean(h, axis=1)                                       # GAP
    bn = (pooled - bn_rmean) / jnp.sqrt(bn_rvar + BN_EPS) * bn_gamma + bn_beta
    return bn


if __name__ == "__main__":
    # Small, module-consistent shapes.
    N, C, H, W = 2, 4, 16, 16     # batch, image channels, spatial
    F = 32                        # backbone / head feature dim

    key = jax.random.PRNGKey(0)
    k_img, k_w, k_b, k_g, k_be, k_rm, k_rv = jax.random.split(key, 7)

    images = jax.random.normal(k_img, (N, C, H, W), dtype=jnp.float32) * 64.0 + 128.0

    # cfg.MODEL.PIXEL_MEAN / PIXEL_STD have len == C.
    pixel_mean = jnp.array([123.675, 116.28, 103.53, 110.0], dtype=jnp.float32)
    pixel_std = jnp.array([58.395, 57.12, 57.375, 60.0], dtype=jnp.float32)

    w_proj = jax.random.normal(k_w, (C, F), dtype=jnp.float32) * 0.1
    b_proj = jax.random.normal(k_b, (F,), dtype=jnp.float32) * 0.01
    bn_gamma = 1.0 + 0.1 * jax.random.normal(k_g, (F,), dtype=jnp.float32)
    bn_beta = 0.1 * jax.random.normal(k_be, (F,), dtype=jnp.float32)
    bn_rmean = 0.05 * jax.random.normal(k_rm, (F,), dtype=jnp.float32)
    bn_rvar = 1.0 + 0.1 * jnp.abs(jax.random.normal(k_rv, (F,), dtype=jnp.float32))

    # TODO(synk): the real backbone/heads come from build_backbone/build_reid_heads
    # (e.g. ResNet-50 + EmbeddingHead); here they are a synthetic 1x1-conv backbone
    # + GAP + BNneck head with the same dataflow.

    out = metalearning_forward(images, pixel_mean, pixel_std,
                               w_proj, b_proj, bn_gamma, bn_beta, bn_rmean, bn_rvar)
    out = jax.block_until_ready(out)

    ref = _reference_forward(images, pixel_mean, pixel_std,
                             w_proj, b_proj, bn_gamma, bn_beta, bn_rmean, bn_rvar)
    assert out.shape == (N, F)
    assert jnp.allclose(out, ref, atol=1e-4, rtol=1e-4), "Pallas kernel mismatch vs reference"

    print("KERNEL_OK")
</pallas_src>

<mosaic_0001>
module attributes {stable_mosaic.version = 11 : i64} {
  func.func @kernel(%arg0: i32, %arg1: memref<4x2x256xf32, #tpu.memory_space<vmem>>, %arg2: memref<32x7xf32, #tpu.memory_space<vmem>>, %arg3: memref<1x32x2xf32, #tpu.memory_space<vmem>>) attributes {dimension_semantics = [#tpu.dimension_semantics<parallel>], iteration_bounds = array<i64: 1>, scalar_prefetch = 0 : i64, scratch_operands = 0 : i64, tpu.core_type = #tpu.core_type<tc>, window_params = [{transform_indices = @transform_0, window_bounds = array<i64: 4, 2, 256>}, {pipeline_mode = #tpu.pipeline_mode<synchronous>, transform_indices = @transform_1, window_bounds = array<i64: 32, 7>}, {transform_indices = @transform_2, window_bounds = array<i64: 1, 32, 2>}]} {
    %c0 = arith.constant 0 : index
    %c0_0 = arith.constant 0 : index
    %0 = vector.load %arg2[%c0, %c0_0] : memref<32x7xf32, #tpu.memory_space<vmem>>, vector<32x7xf32>
    %c0_1 = arith.constant 0 : index
    %c0_2 = arith.constant 0 : index
    %c0_3 = arith.constant 0 : index
    %1 = vector.load %arg1[%c0_1, %c0_2, %c0_3] : memref<4x2x256xf32, #tpu.memory_space<vmem>>, vector<4x2x256xf32>
    %2 = vector.extract_strided_slice %0 {offsets = [0, 0], sizes = [32, 1], strides = [1, 1]} : vector<32x7xf32> to vector<32x1xf32>
    %3 = vector.shape_cast %2 : vector<32x1xf32> to vector<32x1x1xf32>
    %4 = vector.extract_strided_slice %1 {offsets = [0, 0, 0], sizes = [1, 2, 256], strides = [1, 1, 1]} : vector<4x2x256xf32> to vector<1x2x256xf32>
    %5 = vector.broadcast %3 : vector<32x1x1xf32> to vector<32x2x256xf32>
    %6 = vector.broadcast %4 : vector<1x2x256xf32> to vector<32x2x256xf32>
    %7 = arith.mulf %5, %6 : vector<32x2x256xf32>
    %8 = vector.extract_strided_slice %0 {offsets = [0, 1], sizes = [32, 1], strides = [1, 1]} : vector<32x7xf32> to vector<32x1xf32>
    %9 = vector.shape_cast %8 : vector<32x1xf32> to vector<32x1x1xf32>
    %10 = vector.extract_strided_slice %1 {offsets = [1, 0, 0], sizes = [1, 2, 256], strides = [1, 1, 1]} : vector<4x2x256xf32> to vector<1x2x256xf32>
    %11 = vector.broadcast %9 : vector<32x1x1xf32> to vector<32x2x256xf32>
    %12 = vector.broadcast %10 : vector<1x2x256xf32> to vector<32x2x256xf32>
    %13 = arith.mulf %11, %12 : vector<32x2x256xf32>
    %14 = arith.addf %7, %13 : vector<32x2x256xf32>
    %15 = vector.extract_strided_slice %0 {offsets = [0, 2], sizes = [32, 1], strides = [1, 1]} : vector<32x7xf32> to vector<32x1xf32>
    %16 = vector.shape_cast %15 : vector<32x1xf32> to vector<32x1x1xf32>
    %17 = vector.extract_strided_slice %1 {offsets = [2, 0, 0], sizes = [1, 2, 256], strides = [1, 1, 1]} : vector<4x2x256xf32> to vector<1x2x256xf32>
    %18 = vector.broadcast %16 : vector<32x1x1xf32> to vector<32x2x256xf32>
    %19 = vector.broadcast %17 : vector<1x2x256xf32> to vector<32x2x256xf32>
    %20 = arith.mulf %18, %19 : vector<32x2x256xf32>
    %21 = arith.addf %14, %20 : vector<32x2x256xf32>
    %22 = vector.extract_strided_slice %0 {offsets = [0, 3], sizes = [32, 1], strides = [1, 1]} : vector<32x7xf32> to vector<32x1xf32>
    %23 = vector.shape_cast %22 : vector<32x1xf32> to vector<32x1x1xf32>
    %24 = vector.extract_strided_slice %1 {offsets = [3, 0, 0], sizes = [1, 2, 256], strides = [1, 1, 1]} : vector<4x2x256xf32> to vector<1x2x256xf32>
    %25 = vector.broadcast %23 : vector<32x1x1xf32> to vector<32x2x256xf32>
    %26 = vector.broadcast %24 : vector<1x2x256xf32> to vector<32x2x256xf32>
    %27 = arith.mulf %25, %26 : vector<32x2x256xf32>
    %28 = arith.addf %21, %27 : vector<32x2x256xf32>
    %29 = vector.extract_strided_slice %0 {offsets = [0, 4], sizes = [32, 1], strides = [1, 1]} : vector<32x7xf32> to vector<32x1xf32>
    %30 = vector.shape_cast %29 : vector<32x1xf32> to vector<32x1x1xf32>
    %31 = vector.broadcast %30 : vector<32x1x1xf32> to vector<32x2x256xf32>
    %32 = arith.addf %28, %31 : vector<32x2x256xf32>
    %cst = arith.constant 0.000000e+00 : f32
    %33 = vector.broadcast %cst : f32 to vector<32x2x256xf32>
    %34 = arith.maximumf %32, %33 : vector<32x2x256xf32>
    %cst_4 = arith.constant dense<0.000000e+00> : vector<32x2xf32>
    %35 = vector.multi_reduction <add>, %34, %cst_4 [2] : vector<32x2x256xf32> to vector<32x2xf32>
    %36 = vector.extract_strided_slice %0 {offsets = [0, 5], sizes = [32, 1], strides = [1, 1]} : vector<32x7xf32> to vector<32x1xf32>
    %37 = vector.extract_strided_slice %0 {offsets = [0, 6], sizes = [32, 1], strides = [1, 1]} : vector<32x7xf32> to vector<32x1xf32>
    %38 = vector.broadcast %36 : vector<32x1xf32> to vector<32x2xf32>
    %39 = arith.mulf %35, %38 : vector<32x2xf32>
    %40 = vector.broadcast %37 : vector<32x1xf32> to vector<32x2xf32>
    %41 = arith.addf %39, %40 : vector<32x2xf32>
    %c0_5 = arith.constant 0 : index
    %c0_6 = arith.constant 0 : index
    %c0_7 = arith.constant 0 : index
    %42 = vector.load %arg3[%c0_5, %c0_6, %c0_7] : memref<1x32x2xf32, #tpu.memory_space<vmem>>, vector<1x32x2xf32>
    %43 = vector.shape_cast %42 : vector<1x32x2xf32> to vector<32x2xf32>
    %44 = vector.shape_cast %41 : vector<32x2xf32> to vector<1x32x2xf32>
    tpu.vector_store %arg3[%c0_5, %c0_6, %c0_7], %44 {strides = array<i32>} : memref<1x32x2xf32, #tpu.memory_space<vmem>>, vector<1x32x2xf32>,
    return
  }
  func.func @transform_0(%arg0: i32) -> (i32, i32, i32) {
    %c0_i32 = arith.constant 0 : i32
    %c0_i32_0 = arith.constant 0 : i32
    %c0_i32_1 = arith.constant 0 : i32
    return %c0_i32, %arg0, %c0_i32_0 : i32, i32, i32
  }
  func.func @transform_1(%arg0: i32) -> (i32, i32) {
    %c0_i32 = arith.constant 0 : i32
    %c0_i32_0 = arith.constant 0 : i32
    %c0_i32_1 = arith.constant 0 : i32
    return %c0_i32, %c0_i32_0 : i32, i32
  }
  func.func @transform_2(%arg0: i32) -> (i32, i32, i32) {
    %c0_i32 = arith.constant 0 : i32
    %c0_i32_0 = arith.constant 0 : i32
    %c0_i32_1 = arith.constant 0 : i32
    return %arg0, %c0_i32, %c0_i32_0 : i32, i32, i32
  }
}

</mosaic_0001>

<bundles_post_ra>
// kernel: tpu_custom_call.1
= control target key start
LH: loop header
LB: loop body
LE: loop exit
PB: predicated region body
PF: predicated region fallthrough
CT: control target
= control target key end

     0   :  { %v4023_v0 = vlaneseq  ;;  %v4024_v1 = vmov 0   ;;  %v2535_v2 = vmov 1966171168   ;;  %vm1627_vm0 = vcmask 1041408   ;;  %s4020_s1 = inlined_call_operand.vmem [shape: f32[32,7], index: 1, kind: input, shape index: {}]   ;;  %s4021_s0 = inlined_call_operand.vmem [shape: f32[4,2,256], index: 0, kind: input, shape index: {}]   ;;  %s4022_s2 = inlined_call_operand.vmem [shape: f32[1,32,2], index: 2, kind: output, shape index: {}]  }
   0x1   :  { %2511 = vset.pattern.permute.xlu0 %v4024_v1  ;;  %v25_v3 = vunpack.c.l.s4 %v2535_v2  ;;  %2512 = vset.pattern.permute.xlu1 %v4024_v1  ;;  %v11_v4 = vld [vmem:[%s4020_s1] sm:$0xff]  ;;  %v12_v8 = vld [vmem:[%s4020_s1 + $0x8] sm:$0xff]  ;;  %v13_v42 = vld [vmem:[%s4020_s1 + $0x10] sm:$0xff]  ;;  %vm2454_vm1 = vcmask 1041409   ;;  %vm2456_vm2 = vcmask 1042434   ;;  %vm2458_vm3 = vcmask 1043459  }
   0x2   :  { %v2564_v5 = vshrl.u32 %v4023_v0, 7  ;;  %v23_v7 = vcombine.high %v11_v4, %v11_v4  ;;  %v72_v31 = vcombine.high %v12_v8, %v12_v8  ;;  %v121_v53 = vcombine.high %v13_v42, %v13_v42  ;;  %v14_v2 = vld [vmem:[%s4020_s1 + $0x18] sm:$0xff] }
   0x3   :  { %v26_v6 = vunpack.c.0.s8 %v25_v3  ;;  %vm2460_vm4 = vcmask 1044484   ;;  %vm2462_vm5 = vcmask 1045509   ;;  %vm2464_vm6 = vcmask 1046534  }
   0x4   :  { %4031 = vst [vmem:[#allocation2_spill] sm:$0xff] %v2564_v5  ;;  %v2574_v11 = vsub.s32 0, %v2564_v5  ;;  %vm2466_vm7 = vcmask 1047559   ;;  %vm2493_vm8 = vcmask 15360  }
   0x5   :  { %v2570_v9 = vsub.s32 %v26_v6, %v2564_v5 }
   0x6   :  { %4032 = vst [vmem:[#allocation3_spill] sm:$0xff] %v2574_v11 }
   0x7   :  { %v30_v10 = vrot.slane %v11_v4, %v2570_v9  ;;  %v37_v12 = vrot.slane %v23_v7, %v2570_v9  ;;  %v79_v13 = vrot.slane %v12_v8, %v2570_v9  ;;  %v86_v36 = vrot.slane %v72_v31, %v2570_v9 }
   0x8   :  { %v128_v47 = vrot.slane %v13_v42, %v2570_v9  ;;  %v135_v58 = vrot.slane %v121_v53, %v2570_v9  ;;  %v177_v8 = vrot.slane %v14_v2, %v2570_v9 }
   0x9   :  { %v46_v14 = vrot.slane %v30_v10, %v2570_v9  ;;  %v53_v15 = vrot.slane %v37_v12, %v2570_v9  ;;  %v39_v16 = vcombine.high %v37_v12, %v37_v12  ;;  %v38_v17 = vcombine.high %v30_v10, %v30_v10 }
   0xa   :  { %v87_v21 = vcombine.high %v79_v13, %v79_v13  ;;  %v95_v33 = vrot.slane %v79_v13, %v2570_v9  ;;  %v88_v41 = vcombine.high %v86_v36, %v86_v36  ;;  %v102_v44 = vrot.slane %v86_v36, %v2570_v9 }
   0xb   :  { %v2581_v18 = vrot.slane %v46_v14, %v2574_v11  ;;  %v68_v19 = vcombine.high %v46_v14, %v46_v14  ;;  %v67_v20 = vrot.slane %v39_v16, %v2570_v9  ;;  %v2589_v23 = vrot.slane %v53_v15, %v2574_v11 }
   0xc   :  { %v60_v24 = vrot.slane %v38_v17, %v2570_v9  ;;  %v109_v26 = vrot.slane %v87_v21, %v2570_v9  ;;  %v69_v28 = vcombine.high %v53_v15, %v53_v15  ;;  %v2617_v37 = vrot.slane %v95_v33, %v2574_v11 }
   0xd   :  { %348 = vperm.xlu0 %2511, %v2581_v18   ;;  %v2586_v22 = vrot.slane %v68_v19, %v2574_v11  ;;  %v2594_v25 = vrot.slane %v67_v20, %v2574_v11  ;;  %v71_v35 = vcombine.high %v67_v20, %v67_v20  ;;  %v117_v38 = vcombine.high %v95_v33, %v95_v33 }
   0xe   :  { %v2599_v27 = vrot.slane %v60_v24, %v2574_v11  ;;  %v2603_v29 = vrot.slane %v109_v26, %v2574_v11  ;;  %v70_v30 = vcombine.high %v60_v24, %v60_v24  ;;  %v2607_v32 = vrot.slane %v69_v28, %v2574_v11 }
   0xf   :  { %356 = vperm.xlu1 %2512, %v2586_v22   ;;  %v2621_v39 = vrot.slane %v71_v35, %v2574_v11  ;;  %v119_v40 = vcombine.high %v109_v26, %v109_v26  ;;  %v2628_v43 = vrot.slane %v117_v38, %v2574_v11  ;;  %v116_v46 = vrot.slane %v88_v41, %v2570_v9 }
  0x10   :  { %v2612_v34 = vrot.slane %v70_v30, %v2574_v11  ;;  %v2639_v48 = vrot.slane %v102_v44, %v2574_v11  ;;  %v118_v49 = vcombine.high %v102_v44, %v102_v44  ;;  %v136_v52 = vcombine.high %v128_v47, %v128_v47 }
  0x11   :  { %364 = vperm.xlu0 %2511, %v2589_v23   ;;  %v2633_v45 = vrot.slane %v119_v40, %v2574_v11  ;;  %v2643_v50 = vrot.slane %v116_v46, %v2574_v11  ;;  %v120_v51 = vcombine.high %v116_v46, %v116_v46  ;;  %v144_v55 = vrot.slane %v128_v47, %v2570_v9 }
  0x12   :  { %v2647_v54 = vrot.slane %v118_v49, %v2574_v11  ;;  %v158_v57 = vrot.slane %v136_v52, %v2570_v9  ;;  %v137_v63 = vcombine.high %v135_v58, %v135_v58  ;;  %v151_v4 = vrot.slane %v135_v58, %v2570_v9 }
  0x13   :  { %368 = vperm.xlu1 %2512, %v2594_v25   ;;  %v2652_v56 = vrot.slane %v120_v51, %v2574_v11  ;;  %v2658_v59 = vrot.slane %v144_v55, %v2574_v11  ;;  %v166_v60 = vcombine.high %v144_v55, %v144_v55  ;;  %v185_v15 = vcombine.high %v177_v8, %v177_v8 }
  0x14   :  { %v2662_v61 = vrot.slane %v158_v57, %v2574_v11  ;;  %v168_v62 = vcombine.high %v158_v57, %v158_v57  ;;  %v165_v7 = vrot.slane %v137_v63, %v2570_v9  ;;  %v2680_v10 = vrot.slane %v151_v4, %v2574_v11 }
  0x15   :  { %352 = vperm.xlu0 %2511, %v2599_v27   ;;  %v2669_v3 = vrot.slane %v166_v60, %v2574_v11  ;;  %v167_v12 = vcombine.high %v151_v4, %v151_v4  ;;  %v170_v16 = vcombine.high %v14_v2, %v14_v2  ;;  %v193_v19 = vrot.slane %v177_v8, %v2570_v9 }
  0x16   :  { %v2674_v6 = vrot.slane %v168_v62, %v2574_v11  ;;  %v2684_v13 = vrot.slane %v165_v7, %v2574_v11  ;;  %v169_v14 = vcombine.high %v165_v7, %v165_v7  ;;  %v207_v21 = vrot.slane %v185_v15, %v2570_v9 }
  0x17   :  { %384 = vperm.xlu1 %2512, %v2603_v29   ;;  %v2688_v17 = vrot.slane %v167_v12, %v2574_v11  ;;  %v184_v24 = vrot.slane %v170_v16, %v2570_v9  ;;  %v2699_v26 = vrot.slane %v193_v19, %v2574_v11  ;;  %v215_v28 = vcombine.high %v193_v19, %v193_v19 }
  0x18   :  { %v2693_v20 = vrot.slane %v169_v14, %v2574_v11  ;;  %v2703_v30 = vrot.slane %v207_v21, %v2574_v11  ;;  %v217_v31 = vcombine.high %v207_v21, %v207_v21  ;;  %v2536_v49 = vmov 1  }
  0x19   :  { %372 = vperm.xlu0 %2511, %v2607_v32   ;;  %v186_v33 = vcombine.high %v184_v24, %v184_v24  ;;  %v2707_v35 = vrot.slane %v215_v28, %v2574_v11  ;;  %v200_v36 = vrot.slane %v184_v24, %v2570_v9  ;;  %v2537_v57 = vmov 2  }
  0x1a   :  { %v2712_v38 = vrot.slane %v217_v31, %v2574_v11 }
  0x1b   :  { %360 = vperm.xlu1 %2512, %v2612_v34   ;;  %v214_v40 = vrot.slane %v186_v33, %v2570_v9  ;;  %v2717_v41 = vrot.slane %v200_v36, %v2574_v11  ;;  %v216_v42 = vcombine.high %v200_v36, %v200_v36 }
  0x1d   :  { %380 = vperm.xlu0 %2511, %v2617_v37   ;;  %v2721_v44 = vrot.slane %v214_v40, %v2574_v11  ;;  %v218_v46 = vcombine.high %v214_v40, %v214_v40  ;;  %v2725_v47 = vrot.slane %v216_v42, %v2574_v11 }
  0x1f   :  { %376 = vperm.xlu1 %2512, %v2621_v39   ;;  %v2729_v9 = vrot.slane %v218_v46, %v2574_v11 }
  0x21   :  { %388 = vperm.xlu0 %2511, %v2628_v43  }
  0x23   :  { %392 = vperm.xlu1 %2512, %v2633_v45  }
  0x25   :  { %396 = vperm.xlu0 %2511, %v2639_v48  }
  0x27   :  { %400 = vperm.xlu1 %2512, %v2643_v50  }
  0x29   :  { %404 = vperm.xlu0 %2511, %v2647_v54  }
  0x2b   :  { %408 = vperm.xlu1 %2512, %v2652_v56  }
  0x2d   :  { %412 = vperm.xlu0 %2511, %v2658_v59  }
  0x2f   :  { %416 = vperm.xlu1 %2512, %v2662_v61  }
  0x31   :  { %420 = vperm.xlu0 %2511, %v2669_v3  }
  0x33   :  { %424 = vperm.xlu1 %2512, %v2674_v6  }
  0x35   :  { %428 = vperm.xlu0 %2511, %v2680_v10  }
  0x37   :  { %432 = vperm.xlu1 %2512, %v2684_v13  }
  0x39   :  { %436 = vperm.xlu0 %2511, %v2688_v17  }
  0x3b   :  { %440 = vperm.xlu1 %2512, %v2693_v20  }
  0x3d   :  { %444 = vperm.xlu0 %2511, %v2699_v26  }
  0x3f   :  { %448 = vperm.xlu1 %2512, %v2703_v30  }
  0x41   :  { %452 = vperm.xlu0 %2511, %v2707_v35  }
  0x43   :  { %456 = vperm.xlu1 %2512, %v2712_v38  }
  0x45   :  { %460 = vperm.xlu0 %2511, %v2717_v41  }
  0x47   :  { %464 = vperm.xlu1 %2512, %v2721_v44  }
  0x49   :  { %468 = vperm.xlu0 %2511, %v2725_v47  }
  0x4b   :  { %472 = vperm.xlu1 %2512, %v2729_v9  }
  0x4d   :  { %2513 = vset.pattern.permute.xlu0 %v2536_v49 }
  0x4e   :  { %508 = vperm.xlu0 %2513, %v2581_v18  }
  0x4f   :  { %2514 = vset.pattern.permute.xlu1 %v2536_v49 }
  0x50   :  { %512 = vperm.xlu1 %2514, %v2599_v27  }
  0x52   :  { %520 = vperm.xlu0 %2513, %v2612_v34  }
  0x54   :  { %516 = vperm.xlu1 %2514, %v2586_v22  }
  0x56   :  { %528 = vperm.xlu0 %2513, %v2594_v25  }
  0x58   :  { %524 = vperm.xlu1 %2514, %v2589_v23  }
  0x5a   :  { %536 = vperm.xlu0 %2513, %v2621_v39  }
  0x5c   :  { %532 = vperm.xlu1 %2514, %v2607_v32  }
  0x5e   :  { %544 = vperm.xlu0 %2513, %v2603_v29  }
  0x60   :  { %540 = vperm.xlu1 %2514, %v2617_v37  }
  0x62   :  { %552 = vperm.xlu0 %2513, %v2633_v45  }
  0x64   :  { %548 = vperm.xlu1 %2514, %v2628_v43  }
  0x66   :  { %560 = vperm.xlu0 %2513, %v2643_v50  }
  0x68   :  { %556 = vperm.xlu1 %2514, %v2639_v48  }
  0x6a   :  { %568 = vperm.xlu0 %2513, %v2652_v56  }
  0x6c   :  { %564 = vperm.xlu1 %2514, %v2647_v54  }
  0x6e   :  { %576 = vperm.xlu0 %2513, %v2662_v61  }
  0x70   :  { %572 = vperm.xlu1 %2514, %v2658_v59  }
  0x72   :  { %584 = vperm.xlu0 %2513, %v2674_v6  }
  0x74   :  { %580 = vperm.xlu1 %2514, %v2669_v3  }
  0x76   :  { %592 = vperm.xlu0 %2513, %v2684_v13  }
  0x78   :  { %588 = vperm.xlu1 %2514, %v2680_v10  }
  0x7a   :  { %600 = vperm.xlu0 %2513, %v2693_v20  }
  0x7c   :  { %596 = vperm.xlu1 %2514, %v2688_v17  }
  0x7e   :  { %608 = vperm.xlu0 %2513, %v2703_v30  }
  0x80   :  { %604 = vperm.xlu1 %2514, %v2699_v26  }
  0x82   :  { %616 = vperm.xlu0 %2513, %v2712_v38  }
  0x84   :  { %612 = vperm.xlu1 %2514, %v2707_v35  }
  0x86   :  { %624 = vperm.xlu0 %2513, %v2721_v44  }
  0x88   :  { %v2762_v51 = vpop.permute.xlu0 %348  ;;  %620 = vperm.xlu1 %2514, %v2717_v41  }
  0x8a   :  { %v2765_v52 = vpop.permute.xlu1 %356  ;;  %632 = vperm.xlu0 %2513, %v2729_v9  }
  0x8c   :  { %v2768_v53 = vpop.permute.xlu0 %364  ;;  %628 = vperm.xlu1 %2514, %v2725_v47  }
  0x8e   :  { %v2771_v55 = vpop.permute.xlu1 %368  ;;  %2516 = vset.pattern.permute.xlu0 %v2537_v57 }
  0x8f   :  { %704 = vperm.xlu0 %2516, %v2599_v27  }
  0x90   :  { %v2774_v58 = vpop.permute.xlu0 %352  ;;  %2515 = vset.pattern.permute.xlu1 %v2537_v57 }
  0x91   :  { %700 = vperm.xlu1 %2515, %v2581_v18  }
  0x92   :  { %v2777_v60 = vpop.permute.xlu1 %384 }
  0x93   :  { %716 = vperm.xlu0 %2516, %v2589_v23  }
  0x94   :  { %v2780_v62 = vpop.permute.xlu0 %372 }
  0x95   :  { %708 = vperm.xlu1 %2515, %v2586_v22  }
  0x96   :  { %v2783_v63 = vpop.permute.xlu1 %360 }
  0x97   :  { %724 = vperm.xlu0 %2516, %v2607_v32  }
  0x98   :  { %v2786_v2 = vpop.permute.xlu0 %380 }
  0x99   :  { %712 = vperm.xlu1 %2515, %v2612_v34  }
  0x9a   :  { %v2789_v4 = vpop.permute.xlu1 %376 }
  0x9b   :  { %732 = vperm.xlu0 %2516, %v2617_v37  }
  0x9c   :  { %v2792_v7 = vpop.permute.xlu0 %388 }
  0x9d   :  { %720 = vperm.xlu1 %2515, %v2594_v25  }
  0x9e   :  { %v2795_v8 = vpop.permute.xlu1 %392 }
  0x9f   :  { %740 = vperm.xlu0 %2516, %v2628_v43  }
  0xa0   :  { %v2798_v12 = vpop.permute.xlu0 %396 }
  0xa1   :  { %728 = vperm.xlu1 %2515, %v2621_v39  }
  0xa2   :  { %v2801_v14 = vpop.permute.xlu1 %400 }
  0xa3   :  { %748 = vperm.xlu0 %2516, %v2639_v48  }
  0xa4   :  { %v2804_v15 = vpop.permute.xlu0 %404 }
  0xa5   :  { %736 = vperm.xlu1 %2515, %v2603_v29  }
  0xa6   :  { %v2807_v16 = vpop.permute.xlu1 %408 }
  0xa7   :  { %756 = vperm.xlu0 %2516, %v2647_v54  }
  0xa8   :  { %v2810_v19 = vpop.permute.xlu0 %412 }
  0xa9   :  { %4033 = vst [vmem:[#allocation4_spill] sm:$0xff] %v2810_v19  ;;  %744 = vperm.xlu1 %2515, %v2633_v45  }
  0xaa   :  { %v2813_v21 = vpop.permute.xlu1 %416 }
  0xab   :  { %4034 = vst [vmem:[#allocation5_spill] sm:$0xff] %v2813_v21  ;;  %764 = vperm.xlu0 %2516, %v2658_v59  }
  0xac   :  { %v2816_v24 = vpop.permute.xlu0 %420 }
  0xad   :  { %4035 = vst [vmem:[#allocation6_spill] sm:$0xff] %v2816_v24  ;;  %752 = vperm.xlu1 %2515, %v2643_v50  }
  0xae   :  { %v2819_v28 = vpop.permute.xlu1 %424 }
  0xaf   :  { %4036 = vst [vmem:[#allocation7_spill] sm:$0xff] %v2819_v28  ;;  %772 = vperm.xlu0 %2516, %v2669_v3  }
  0xb0   :  { %v2822_v31 = vpop.permute.xlu0 %428 }
  0xb1   :  { %4037 = vst [vmem:[#allocation8_spill] sm:$0xff] %v2822_v31  ;;  %760 = vperm.xlu1 %2515, %v2652_v56  }
  0xb2   :  { %v2825_v33 = vpop.permute.xlu1 %432 }
  0xb3   :  { %4038 = vst [vmem:[#allocation9_spill] sm:$0xff] %v2825_v33  ;;  %780 = vperm.xlu0 %2516, %v2680_v10  }
  0xb4   :  { %v2828_v36 = vpop.permute.xlu0 %436 }
  0xb5   :  { %4039 = vst [vmem:[#allocation10_spill] sm:$0xff] %v2828_v36  ;;  %768 = vperm.xlu1 %2515, %v2662_v61  }
  0xb6   :  { %v2831_v40 = vpop.permute.xlu1 %440 }
  0xb7   :  { %4040 = vst [vmem:[#allocation11_spill] sm:$0xff] %v2831_v40  ;;  %788 = vperm.xlu0 %2516, %v2688_v17   ;;  %v2538_v40 = vmov 3  }
  0xb8   :  { %v2834_v42 = vpop.permute.xlu0 %444 }
  0xb9   :  { %4041 = vst [vmem:[#allocation12_spill] sm:$0xff] %v2834_v42  ;;  %776 = vperm.xlu1 %2515, %v2674_v6  }
  0xba   :  { %v2837_v46 = vpop.permute.xlu1 %448 }
  0xbb   :  { %796 = vperm.xlu0 %2516, %v2699_v26  }
  0xbc   :  { %v2840_v49 = vpop.permute.xlu0 %452 }
  0xbd   :  { %4042 = vst [vmem:[#allocation13_spill] sm:$0xff] %v2840_v49  ;;  %784 = vperm.xlu1 %2515, %v2684_v13  }
  0xbe   :  { %v2843_v57 = vpop.permute.xlu1 %456 }
  0xbf   :  { %804 = vperm.xlu0 %2516, %v2707_v35  }
  0xc0   :  { %v2846_v0 = vpop.permute.xlu0 %460 }
  0xc1   :  { %4043 = vst [vmem:[#allocation14_spill] sm:$0xff] %v2846_v0  ;;  %792 = vperm.xlu1 %2515, %v2693_v20  }
  0xc2   :  { %v2849_v1 = vpop.permute.xlu1 %464 }
  0xc3   :  { %812 = vperm.xlu0 %2516, %v2717_v41  }
  0xc4   :  { %v2852_v11 = vpop.permute.xlu0 %468 }
  0xc5   :  { %4044 = vst [vmem:[#allocation15_spill] sm:$0xff] %v2852_v11  ;;  %800 = vperm.xlu1 %2515, %v2703_v30  }
  0xc6   :  { %v2855_v42 = vpop.permute.xlu1 %472 }
  0xc7   :  { %820 = vperm.xlu0 %2516, %v2725_v47  }
  0xc9   :  { %v2858_v49 = vpop.permute.xlu0 %508  ;;  %808 = vperm.xlu1 %2515, %v2712_v38  }
  0xca   :  { %4045 = vst [vmem:[#allocation16_spill] sm:$0xff] %v2858_v49 }
  0xcb   :  { %2517 = vset.pattern.permute.xlu0 %v2538_v40  ;;  %v2861_v0 = vpop.permute.xlu1 %512 }
  0xcc   :  { %4046 = vst [vmem:[#allocation17_spill] sm:$0xff] %v2861_v0  ;;  %892 = vperm.xlu0 %2517, %v2581_v18  }
  0xcd   :  { %v2864_v36 = vpop.permute.xlu0 %520  ;;  %816 = vperm.xlu1 %2515, %v2721_v44  }
  0xce   :  { %4047 = vst [vmem:[#allocation18_spill] sm:$0xff] %v2864_v36 }
  0xcf   :  { %v2867_v11 = vpop.permute.xlu1 %516 }
  0xd0   :  { %4048 = vst [vmem:[#allocation19_spill] sm:$0xff] %v2867_v11  ;;  %904 = vperm.xlu0 %2517, %v2612_v34  }
  0xd1   :  { %v2870_v33 = vpop.permute.xlu0 %528  ;;  %824 = vperm.xlu1 %2515, %v2729_v9  }
  0xd2   :  { %4049 = vst [vmem:[#allocation20_spill] sm:$0xff] %v2870_v33 }
  0xd3   :  { %v2873_v49 = vpop.permute.xlu1 %524 }
  0xd4   :  { %4050 = vst [vmem:[#allocation21_spill] sm:$0xff] %v2873_v49  ;;  %912 = vperm.xlu0 %2517, %v2594_v25  }
  0xd5   :  { %v2876_v31 = vpop.permute.xlu0 %536  ;;  %2518 = vset.pattern.permute.xlu1 %v2538_v40 }
  0xd6   :  { %4051 = vst [vmem:[#allocation22_spill] sm:$0xff] %v2876_v31  ;;  %896 = vperm.xlu1 %2518, %v2599_v27  }
  0xd7   :  { %v2879_v36 = vpop.permute.xlu1 %532 }
  0xd8   :  { %4052 = vst [vmem:[#allocation23_spill] sm:$0xff] %v2879_v36  ;;  %920 = vperm.xlu0 %2517, %v2621_v39  }
  0xd9   :  { %v2882_v11 = vpop.permute.xlu0 %544 }
  0xda   :  { %4053 = vst [vmem:[#allocation24_spill] sm:$0xff] %v2882_v11  ;;  %900 = vperm.xlu1 %2518, %v2586_v22  }
  0xdb   :  { %v2885_v33 = vpop.permute.xlu1 %540 }
  0xdc   :  { %4054 = vst [vmem:[#allocation25_spill] sm:$0xff] %v2885_v33  ;;  %928 = vperm.xlu0 %2517, %v2603_v29  }
  0xdd   :  { %v2888_v49 = vpop.permute.xlu0 %552 }
  0xde   :  { %4055 = vst [vmem:[#allocation26_spill] sm:$0xff] %v2888_v49  ;;  %908 = vperm.xlu1 %2518, %v2589_v23  }
  0xdf   :  { %v2891_v31 = vpop.permute.xlu1 %548 }
  0xe0   :  { %4056 = vst [vmem:[#allocation27_spill] sm:$0xff] %v2891_v31  ;;  %936 = vperm.xlu0 %2517, %v2633_v45  }
  0xe1   :  { %v2894_v40 = vpop.permute.xlu0 %560 }
  0xe2   :  { %4057 = vst [vmem:[#allocation28_spill] sm:$0xff] %v2894_v40  ;;  %916 = vperm.xlu1 %2518, %v2607_v32  }
  0xe3   :  { %v2897_v36 = vpop.permute.xlu1 %556 }
  0xe4   :  { %4058 = vst [vmem:[#allocation29_spill] sm:$0xff] %v2897_v36  ;;  %944 = vperm.xlu0 %2517, %v2643_v50  }
  0xe5   :  { %v2900_v11 = vpop.permute.xlu0 %568 }
  0xe6   :  { %4059 = vst [vmem:[#allocation30_spill] sm:$0xff] %v2900_v11  ;;  %924 = vperm.xlu1 %2518, %v2617_v37  }
  0xe7   :  { %v2903_v33 = vpop.permute.xlu1 %564 }
  0xe8   :  { %4060 = vst [vmem:[#allocation31_spill] sm:$0xff] %v2903_v33  ;;  %952 = vperm.xlu0 %2517, %v2652_v56  }
  0xe9   :  { %v2906_v49 = vpop.permute.xlu0 %576 }
  0xea   :  { %4061 = vst [vmem:[#allocation32_spill] sm:$0xff] %v2906_v49  ;;  %932 = vperm.xlu1 %2518, %v2628_v43  }
  0xeb   :  { %v2909_v31 = vpop.permute.xlu1 %572 }
  0xec   :  { %4062 = vst [vmem:[#allocation33_spill] sm:$0xff] %v2909_v31  ;;  %960 = vperm.xlu0 %2517, %v2662_v61  }
  0xed   :  { %v2912_v40 = vpop.permute.xlu0 %584 }
  0xee   :  { %4063 = vst [vmem:[#allocation34_spill] sm:$0xff] %v2912_v40  ;;  %940 = vperm.xlu1 %2518, %v2639_v48  }
  0xef   :  { %v2915_v36 = vpop.permute.xlu1 %580 }
  0xf0   :  { %4064 = vst [vmem:[#allocation35_spill] sm:$0xff] %v2915_v36  ;;  %968 = vperm.xlu0 %2517, %v2674_v6   ;;  %v2933_v36 = vld [vmem:[%s4021_s0] sm:$0xf] }
  0xf1   :  { %v2918_v11 = vpop.permute.xlu0 %592  ;;  %v502_v24 = vmul.f32 %v2843_v57, %v2933_v36 }
  0xf2   :  { %4065 = vst [vmem:[#allocation36_spill] sm:$0xff] %v2918_v11  ;;  %948 = vperm.xlu1 %2518, %v2647_v54   ;;  %v2938_v11 = vld [vmem:[%s4021_s0 + $0x4] sm:$0xf] }
  0xf3   :  { %v2921_v33 = vpop.permute.xlu1 %588 }
  0xf4   :  { %4066 = vst [vmem:[#allocation37_spill] sm:$0xff] %v2921_v33  ;;  %976 = vperm.xlu0 %2517, %v2684_v13  }
  0xf5   :  { %v2924_v49 = vpop.permute.xlu0 %600 }
  0xf6   :  { %4067 = vst [vmem:[#allocation38_spill] sm:$0xff] %v2924_v49  ;;  %956 = vperm.xlu1 %2518, %v2658_v59   ;;  %v500_v49 = vmul.f32 %v2837_v46, %v2933_v36 }
  0xf7   :  { %v2927_v31 = vpop.permute.xlu1 %596 }
  0xf8   :  { %4068 = vst [vmem:[#allocation39_spill] sm:$0xff] %v2927_v31  ;;  %984 = vperm.xlu0 %2517, %v2693_v20  }
  0xf9   :  { %v609_v33 = vpop.permute.xlu0 %608 }
  0xfa   :  { %v660_v40 = vmul.f32 %v609_v33, %v2938_v11  ;;  %964 = vperm.xlu1 %2518, %v2669_v3  }
  0xfb   :  { %v2944_v31 = vpop.permute.xlu1 %604 }
  0xfc   :  { %v2946_v0 = vadd.f32 %v660_v40, %v500_v49  ;;  %992 = vperm.xlu0 %2517, %v2703_v30   ;;  %v504_v49 = vmul.f32 %v2849_v1, %v2933_v36 }
  0xfd   :  { %v617_v28 = vpop.permute.xlu0 %616 }
  0xfe   :  { %4069 = vst [vmem:[#allocation40_spill] sm:$0xff] %v2946_v0  ;;  %v662_v21 = vmul.f32 %v617_v28, %v2938_v11  ;;  %972 = vperm.xlu1 %2518, %v2680_v10  }
  0xff   :  { %v2953_v19 = vpop.permute.xlu1 %612 }
 0x100   :  { %v2955_v46 = vadd.f32 %v662_v21, %v502_v24  ;;  %1000 = vperm.xlu0 %2517, %v2712_v38   ;;  %v506_v21 = vmul.f32 %v2855_v42, %v2933_v36 }
 0x101   :  { %v625_v33 = vpop.permute.xlu0 %624 }
 0x102   :  { %4070 = vst [vmem:[#allocation41_spill] sm:$0xff] %v2955_v46  ;;  %v664_v40 = vmul.f32 %v625_v33, %v2938_v11  ;;  %980 = vperm.xlu1 %2518, %v2688_v17  }
 0x103   :  { %v2962_v0 = vpop.permute.xlu1 %620 }
 0x104   :  { %v2964_v57 = vadd.f32 %v664_v40, %v504_v49  ;;  %1008 = vperm.xlu0 %2517, %v2721_v44   ;;  %v2539_v49 = vmov 4  }
 0x105   :  { %v633_v28 = vpop.permute.xlu0 %632 }
 0x106   :  { %4071 = vst [vmem:[#allocation42_spill] sm:$0xff] %v2964_v57  ;;  %v666_v24 = vmul.f32 %v633_v28, %v2938_v11  ;;  %988 = vperm.xlu1 %2518, %v2699_v26  }
 0x107   :  { %v2971_v46 = vpop.permute.xlu1 %628 }
 0x108   :  { %v2973_v1 = vadd.f32 %v666_v24, %v506_v21  ;;  %1016 = vperm.xlu0 %2517, %v2729_v9  }
 0x10a   :  { %4072 = vst [vmem:[#allocation43_spill] sm:$0xff] %v2973_v1  ;;  %v2976_v33 = vpop.permute.xlu0 %704  ;;  %996 = vperm.xlu1 %2518, %v2707_v35  }
 0x10c   :  { %2520 = vset.pattern.permute.xlu0 %v2539_v49  ;;  %v2979_v40 = vpop.permute.xlu1 %700 }
 0x10d   :  { %1088 = vperm.xlu0 %2520, %v2599_v27  }
 0x10e   :  { %v2982_v42 = vpop.permute.xlu0 %716  ;;  %1004 = vperm.xlu1 %2518, %v2717_v41  }
 0x110   :  { %v2985_v28 = vpop.permute.xlu1 %708 }
 0x111   :  { %1100 = vperm.xlu0 %2520, %v2589_v23  }
 0x112   :  { %v2988_v21 = vpop.permute.xlu0 %724  ;;  %1012 = vperm.xlu1 %2518, %v2725_v47  }
 0x114   :  { %v2991_v24 = vpop.permute.xlu1 %712 }
 0x115   :  { %4073 = vst [vmem:[#allocation44_spill] sm:$0xff] %v2991_v24  ;;  %1108 = vperm.xlu0 %2520, %v2607_v32  }
 0x116   :  { %v2994_v57 = vpop.permute.xlu0 %732  ;;  %2519 = vset.pattern.permute.xlu1 %v2539_v49 }
 0x117   :  { %1084 = vperm.xlu1 %2519, %v2581_v18  }
 0x118   :  { %v2997_v27 = vpop.permute.xlu1 %720 }
 0x119   :  { %1116 = vperm.xlu0 %2520, %v2617_v37  }
 0x11a   :  { %v3000_v1 = vpop.permute.xlu0 %740 }
 0x11b   :  { %1092 = vperm.xlu1 %2519, %v2586_v22  }
 0x11c   :  { %v3003_v23 = vpop.permute.xlu1 %728 }
 0x11d   :  { %1124 = vperm.xlu0 %2520, %v2628_v43  }
 0x11e   :  { %v3006_v24 = vpop.permute.xlu0 %748 }
 0x11f   :  { %1096 = vperm.xlu1 %2519, %v2612_v34  }
 0x120   :  { %v3009_v32 = vpop.permute.xlu1 %736 }
 0x121   :  { %4074 = vst [vmem:[#allocation45_spill] sm:$0xff] %v3009_v32  ;;  %1132 = vperm.xlu0 %2520, %v2639_v48  }
 0x122   :  { %v3012_v18 = vpop.permute.xlu0 %756 }
 0x123   :  { %4075 = vst [vmem:[#allocation46_spill] sm:$0xff] %v3012_v18  ;;  %1104 = vperm.xlu1 %2519, %v2594_v25  }
 0x124   :  { %v3015_v37 = vpop.permute.xlu1 %744 }
 0x125   :  { %4076 = vst [vmem:[#allocation47_spill] sm:$0xff] %v3015_v37  ;;  %1140 = vperm.xlu0 %2520, %v2647_v54   ;;  %v4137_v37 = vld [vmem:[#allocation26_spill] sm:$0xff] }
 0x126   :  { %v3018_v22 = vpop.permute.xlu0 %764 }
 0x127   :  { %4077 = vst [vmem:[#allocation48_spill] sm:$0xff] %v3018_v22  ;;  %1112 = vperm.xlu1 %2519, %v2621_v39  }
 0x128   :  { %v3021_v43 = vpop.permute.xlu1 %752 }
 0x129   :  { %4078 = vst [vmem:[#allocation49_spill] sm:$0xff] %v3021_v43  ;;  %1148 = vperm.xlu0 %2520, %v2658_v59  }
 0x12a   :  { %v3024_v34 = vpop.permute.xlu0 %772 }
 0x12b   :  { %4079 = vst [vmem:[#allocation50_spill] sm:$0xff] %v3024_v34  ;;  %1120 = vperm.xlu1 %2519, %v2603_v29  }
 0x12c   :  { %v3027_v48 = vpop.permute.xlu1 %760 }
 0x12d   :  { %4080 = vst [vmem:[#allocation51_spill] sm:$0xff] %v3027_v48  ;;  %1156 = vperm.xlu0 %2520, %v2669_v3   ;;  %v4130_v48 = vld [vmem:[#allocation13_spill] sm:$0xff] }
 0x12e   :  { %v3030_v25 = vpop.permute.xlu0 %780 }
 0x12f   :  { %4081 = vst [vmem:[#allocation52_spill] sm:$0xff] %v3030_v25  ;;  %1128 = vperm.xlu1 %2519, %v2633_v45   ;;  %v4129_v25 = vld [vmem:[#allocation12_spill] sm:$0xff] }
 0x130   :  { %v3033_v54 = vpop.permute.xlu1 %768 }
 0x131   :  { %4082 = vst [vmem:[#allocation53_spill] sm:$0xff] %v3033_v54  ;;  %1164 = vperm.xlu0 %2520, %v2680_v10   ;;  %v4128_v54 = vld [vmem:[#allocation23_spill] sm:$0xff] }
 0x132   :  { %v3036_v39 = vpop.permute.xlu0 %788 }
 0x133   :  { %4083 = vst [vmem:[#allocation54_spill] sm:$0xff] %v3036_v39  ;;  %1136 = vperm.xlu1 %2519, %v2643_v50   ;;  %v4127_v39 = vld [vmem:[#allocation22_spill] sm:$0xff] }
 0x134   :  { %v3039_v59 = vpop.permute.xlu1 %776 }
 0x135   :  { %4084 = vst [vmem:[#allocation55_spill] sm:$0xff] %v3039_v59  ;;  %1172 = vperm.xlu0 %2520, %v2688_v17   ;;  %v4126_v59 = vld [vmem:[#allocation21_spill] sm:$0xff] }
 0x136   :  { %v3042_v29 = vpop.permute.xlu0 %796 }
 0x137   :  { %4085 = vst [vmem:[#allocation56_spill] sm:$0xff] %v3042_v29  ;;  %1144 = vperm.xlu1 %2519, %v2652_v56  }
 0x138   :  { %v3045_v3 = vpop.permute.xlu1 %784 }
 0x139   :  { %4086 = vst [vmem:[#allocation57_spill] sm:$0xff] %v3045_v3  ;;  %1180 = vperm.xlu0 %2520, %v2699_v26   ;;  %v4123_v3 = vld [vmem:[#allocation20_spill] sm:$0xff] }
 0x13a   :  { %v3048_v45 = vpop.permute.xlu0 %804 }
 0x13b   :  { %4087 = vst [vmem:[#allocation58_spill] sm:$0xff] %v3048_v45  ;;  %1152 = vperm.xlu1 %2519, %v2662_v61   ;;  %v4122_v45 = vld [vmem:[#allocation19_spill] sm:$0xff] }
 0x13c   :  { %v3051_v10 = vpop.permute.xlu1 %792 }
 0x13d   :  { %4088 = vst [vmem:[#allocation59_spill] sm:$0xff] %v3051_v10  ;;  %1188 = vperm.xlu0 %2520, %v2707_v35  }
 0x13e   :  { %v3054_v50 = vpop.permute.xlu0 %812 }
 0x13f   :  { %4089 = vst [vmem:[#allocation60_spill] sm:$0xff] %v3054_v50  ;;  %1160 = vperm.xlu1 %2519, %v2674_v6   ;;  %v4120_v50 = vld [vmem:[#allocation17_spill] sm:$0xff] }
 0x140   :  { %v3057_v17 = vpop.permute.xlu1 %800  ;;  %v636_v10 = vmul.f32 %v4120_v50, %v2938_v11  ;;  %v642_v50 = vmul.f32 %v4127_v39, %v2938_v11 }
 0x141   :  { %4090 = vst [vmem:[#allocation61_spill] sm:$0xff] %v3057_v17  ;;  %1196 = vperm.xlu0 %2520, %v2717_v41  }
 0x142   :  { %v3060_v56 = vpop.permute.xlu0 %820 }
 0x143   :  { %4091 = vst [vmem:[#allocation62_spill] sm:$0xff] %v3060_v56  ;;  %1168 = vperm.xlu1 %2519, %v2684_v13  }
 0x144   :  { %v3063_v26 = vpop.permute.xlu1 %808 }
 0x145   :  { %4092 = vst [vmem:[#allocation63_spill] sm:$0xff] %v3063_v26  ;;  %1204 = vperm.xlu0 %2520, %v2725_v47  }
 0x147   :  { %v3066_v61 = vpop.permute.xlu0 %892  ;;  %1176 = vperm.xlu1 %2519, %v2693_v20  }
 0x148   :  { %4093 = vst [vmem:[#allocation64_spill] sm:$0xff] %v3066_v61  ;;  %v3069_v35 = vpop.permute.xlu1 %816 }
 0x149   :  { %4094 = vst [vmem:[#allocation65_spill] sm:$0xff] %v3069_v35 }
 0x14b   :  { %v3071_v49 = vpop.permute.xlu0 %904  ;;  %1184 = vperm.xlu1 %2519, %v2703_v30  }
 0x14c   :  { %4095 = vst [vmem:[#allocation66_spill] sm:$0xff] %v3071_v49  ;;  %v3074_v6 = vpop.permute.xlu1 %824  ;;  %v2540_v49 = vmov 1983009808  }
 0x14d   :  { %4096 = vst [vmem:[#allocation67_spill] sm:$0xff] %v3074_v6 }
 0x14f   :  { %v3076_v41 = vpop.permute.xlu0 %912  ;;  %1192 = vperm.xlu1 %2519, %v2712_v38   ;;  %v2541_v38 = vmov 5  }
 0x150   :  { %4097 = vst [vmem:[#allocation68_spill] sm:$0xff] %v3076_v41  ;;  %v1308_v41 = vunpack.c.l.s4 %v2540_v49  ;;  %2522 = vset.pattern.permute.xlu0 %v2541_v38  ;;  %v477_v49 = vmul.f32 %v2765_v52, %v2933_v36  ;;  %v478_v52 = vmul.f32 %v2783_v63, %v2933_v36  ;;  %v489_v63 = vmul.f32 %v2804_v15, %v2933_v36  ;;  %v4116_v15 = vld [vmem:[#allocation8_spill] sm:$0xff] }
 0x151   :  { %v3079_v13 = vpop.permute.xlu1 %896 }
 0x152   :  { %4098 = vst [vmem:[#allocation69_spill] sm:$0xff] %v3079_v13  ;;  %v640_v13 = vmul.f32 %v4123_v3, %v2938_v11  ;;  %v501_v3 = vmul.f32 %v4130_v48, %v2933_v36  ;;  %v646_v48 = vmul.f32 %v4137_v37, %v2938_v11  ;;  %v4140_v37 = vld [vmem:[#allocation28_spill] sm:$0xff] }
 0x153   :  { %v3081_v26 = vpop.permute.xlu0 %920  ;;  %1200 = vperm.xlu1 %2519, %v2721_v44   ;;  %v1309_v44 = vunpack.c.0.s8 %v1308_v41 }
 0x154   :  { %4099 = vst [vmem:[#allocation70_spill] sm:$0xff] %v3081_v26 }
 0x155   :  { %v3084_v47 = vpop.permute.xlu1 %900 }
 0x156   :  { %4100 = vst [vmem:[#allocation71_spill] sm:$0xff] %v3084_v47 }
 0x157   :  { %v3086_v20 = vpop.permute.xlu0 %928  ;;  %1208 = vperm.xlu1 %2519, %v2729_v9   ;;  %v3102_v9 = vsub.s32 %v1309_v44, %v2564_v5  ;;  %v484_v44 = vmul.f32 %v2777_v60, %v2933_v36  ;;  %v485_v5 = vmul.f32 %v2792_v7, %v2933_v36  ;;  %v487_v60 = vmul.f32 %v2798_v12, %v2933_v36  ;;  %v4114_v12 = vld [vmem:[#allocation7_spill] sm:$0xff] }
 0x158   :  { %4101 = vst [vmem:[#allocation72_spill] sm:$0xff] %v3086_v20  ;;  %v479_v20 = vmul.f32 %v2768_v53, %v2933_v36  ;;  %v483_v53 = vmul.f32 %v2786_v2, %v2933_v36  ;;  %v490_v2 = vmul.f32 %v2807_v16, %v2933_v36  ;;  %v4117_v16 = vld [vmem:[#allocation9_spill] sm:$0xff] }
 0x159   :  { %v3089_v35 = vpop.permute.xlu1 %908  ;;  %4108 = vst [vmem:[#allocation79_spill] sm:$0xff] %v3102_v9 }
 0x15a   :  { %4102 = vst [vmem:[#allocation73_spill] sm:$0xff] %v3089_v35  ;;  %v4118_v35 = vld [vmem:[#allocation10_spill] sm:$0xff] }
 0x15b   :  { %v3091_v30 = vpop.permute.xlu0 %936  ;;  %2521 = vset.pattern.permute.xlu1 %v2541_v38  ;;  %v480_v38 = vmul.f32 %v2771_v55, %v2933_v36  ;;  %v482_v55 = vmul.f32 %v2789_v4, %v2933_v36  ;;  %v4111_v4 = vld [vmem:[#allocation4_spill] sm:$0xff]  ;;  %v3162_v17 = vmul.f32 %v4118_v35, %v2933_v36  ;;  %v4125_v35 = vld [vmem:[#allocation11_spill] sm:$0xff] }
 0x15c   :  { %4103 = vst [vmem:[#allocation74_spill] sm:$0xff] %v3091_v30  ;;  %v475_v30 = vmul.f32 %v2762_v51, %v2933_v36  ;;  %v481_v51 = vmul.f32 %v2780_v62, %v2933_v36  ;;  %v488_v62 = vmul.f32 %v2801_v14, %v2933_v36  ;;  %v3142_v7 = vmul.f32 %v4111_v4, %v2933_v36 }
 0x15d   :  { %v3093_v61 = vpop.permute.xlu1 %916  ;;  %v494_v14 = vmul.f32 %v4114_v12, %v2933_v36  ;;  %v496_v4 = vmul.f32 %v4117_v16, %v2933_v36  ;;  %v4121_v12 = vld [vmem:[#allocation18_spill] sm:$0xff]  ;;  %v498_v29 = vmul.f32 %v4125_v35, %v2933_v36  ;;  %v4132_v35 = vld [vmem:[#allocation24_spill] sm:$0xff] }
 0x15e   :  { %4104 = vst [vmem:[#allocation75_spill] sm:$0xff] %v3093_v61  ;;  %v3156_v61 = vmul.f32 %v4116_v15, %v2933_v36  ;;  %v637_v15 = vmul.f32 %v4122_v45, %v2938_v11  ;;  %v499_v45 = vmul.f32 %v4129_v25, %v2933_v36  ;;  %v644_v43 = vmul.f32 %v4132_v35, %v2938_v11 }
 0x15f   :  { %v3095_v26 = vpop.permute.xlu0 %944  ;;  %v3210_v35 = vadd.f32 %v640_v13, %v480_v38  ;;  %v4142_v13 = vld [vmem:[#allocation30_spill] sm:$0xff] }
 0x160   :  { %4105 = vst [vmem:[#allocation76_spill] sm:$0xff] %v3095_v26  ;;  %v3208_v32 = vadd.f32 %v637_v15, %v477_v49  ;;  %v650_v49 = vmul.f32 %v4142_v13, %v2938_v11  ;;  %v4147_v15 = vld [vmem:[#allocation33_spill] sm:$0xff] }
 0x161   :  { %v3097_v56 = vpop.permute.xlu1 %924 }
 0x162   :  { %4106 = vst [vmem:[#allocation77_spill] sm:$0xff] %v3097_v56 }
 0x163   :  { %v3099_v47 = vpop.permute.xlu0 %952 }
 0x164   :  { %4107 = vst [vmem:[#allocation78_spill] sm:$0xff] %v3099_v47  ;;  %v476_v47 = vmul.f32 %v2774_v58, %v2933_v36  ;;  %v486_v58 = vmul.f32 %v2795_v8, %v2933_v36  ;;  %v4112_v8 = vld [vmem:[#allocation5_spill] sm:$0xff] }
 0x165   :  { %v3112_v41 = vpop.permute.xlu1 %932  ;;  %v492_v56 = vmul.f32 %v4112_v8, %v2933_v36  ;;  %v4119_v8 = vld [vmem:[#allocation16_spill] sm:$0xff] }
 0x166   :  { %4109 = vst [vmem:[#allocation80_spill] sm:$0xff] %v3112_v41  ;;  %v3204_v18 = vadd.f32 %v636_v10, %v476_v47  ;;  %v648_v10 = vmul.f32 %v4140_v37, %v2938_v11  ;;  %v4141_v47 = vld [vmem:[#allocation29_spill] sm:$0xff] }
 0x167   :  { %v3130_v41 = vpop.permute.xlu0 %960 }
 0x168   :  { %4110 = vst [vmem:[#allocation81_spill] sm:$0xff] %v3130_v41  ;;  %v4113_v41 = vld [vmem:[#allocation6_spill] sm:$0xff] }
 0x169   :  { %v3148_v26 = vmul.f32 %v4113_v41, %v2933_v36  ;;  %v3152_v9 = vpop.permute.xlu1 %940  ;;  %v635_v41 = vmul.f32 %v4119_v8, %v2938_v11  ;;  %v639_v8 = vmul.f32 %v4126_v59, %v2938_v11  ;;  %v4134_v59 = vld [vmem:[#allocation15_spill] sm:$0xff] }
 0x16a   :  { %4115 = vst [vmem:[#allocation4_spill] sm:$0xff] %v3152_v9  ;;  %v638_v9 = vmul.f32 %v4121_v12, %v2938_v11  ;;  %v641_v12 = vmul.f32 %v4128_v54, %v2938_v11  ;;  %v3196_v39 = vmul.f32 %v4134_v59, %v2933_v36  ;;  %v4136_v54 = vld [vmem:[#allocation25_spill] sm:$0xff]  ;;  %v3214_v59 = vadd.f32 %v642_v50, %v482_v55  ;;  %v4148_v50 = vld [vmem:[#allocation34_spill] sm:$0xff] }
 0x16b   :  { %v3174_v16 = vpop.permute.xlu0 %968  ;;  %v3198_v22 = vadd.f32 %v635_v41, %v475_v30  ;;  %v643_v25 = vmul.f32 %v4136_v54, %v2938_v11  ;;  %v4139_v41 = vld [vmem:[#allocation27_spill] sm:$0xff] }
 0x16c   :  { %4124 = vst [vmem:[#allocation5_spill] sm:$0xff] %v3174_v16  ;;  %v4131_v16 = vld [vmem:[#allocation14_spill] sm:$0xff]  ;;  %v3216_v30 = vadd.f32 %v641_v12, %v481_v51  ;;  %v645_v54 = vmul.f32 %v4139_v41, %v2938_v11  ;;  %v4145_v51 = vld [vmem:[#allocation31_spill] sm:$0xff]  ;;  %v654_v12 = vmul.f32 %v4148_v50, %v2938_v11 }
 0x16d   :  { %v503_v34 = vmul.f32 %v4131_v16, %v2933_v36  ;;  %v3192_v6 = vpop.permute.xlu1 %948  ;;  %4135 = vst [vmem:[#allocation7_spill] sm:$0xff] %v3198_v22  ;;  %v3206_v16 = vadd.f32 %v638_v9, %v478_v52  ;;  %v671_v36 = vadd.f32 %v639_v8, %v479_v20  ;;  %v3220_v22 = vadd.f32 %v644_v43, %v484_v44  ;;  %v4146_v43 = vld [vmem:[#allocation32_spill] sm:$0xff]  ;;  %v4149_v41 = vld [vmem:[#allocation35_spill] sm:$0xff] }
 0x16e   :  { %4133 = vst [vmem:[#allocation6_spill] sm:$0xff] %v3192_v6  ;;  %v647_v9 = vmul.f32 %v4141_v47, %v2938_v11  ;;  %v675_v20 = vadd.f32 %v643_v25, %v483_v53  ;;  %v3230_v52 = vadd.f32 %v646_v48, %v486_v58  ;;  %v649_v55 = vmul.f32 %v4145_v51, %v2938_v11  ;;  %v4150_v47 = vld [vmem:[#allocation36_spill] sm:$0xff]  ;;  %v4151_v48 = vld [vmem:[#allocation37_spill] sm:$0xff]  ;;  %v4152_v51 = vld [vmem:[#allocation38_spill] sm:$0xff] }
 0x16f   :  { %v3212_v6 = vpop.permute.xlu0 %976  ;;  %v652_v44 = vmul.f32 %v4146_v43, %v2938_v11  ;;  %v651_v8 = vmul.f32 %v4147_v15, %v2938_v11  ;;  %v653_v37 = vmul.f32 %v4149_v41, %v2938_v11  ;;  %v656_v53 = vmul.f32 %v4150_v47, %v2938_v11  ;;  %v4153_v15 = vld [vmem:[#allocation39_spill] sm:$0xff] }
 0x170   :  { %4138 = vst [vmem:[#allocation8_spill] sm:$0xff] %v3212_v6  ;;  %4144 = vst [vmem:[#allocation10_spill] sm:$0xff] %v3230_v52  ;;  %v677_v25 = vadd.f32 %v645_v54, %v485_v5  ;;  %v655_v13 = vmul.f32 %v4151_v48, %v2938_v11  ;;  %v658_v43 = vmul.f32 %v4152_v51, %v2938_v11 }
 0x171   :  { %v3228_v38 = vpop.permute.xlu1 %956  ;;  %v3252_v6 = vadd.f32 %v648_v10, %v488_v62  ;;  %v679_v50 = vadd.f32 %v647_v9, %v487_v60  ;;  %v3254_v52 = vadd.f32 %v650_v49, %v490_v2  ;;  %v659_v41 = vmul.f32 %v2944_v31, %v2938_v11  ;;  %v3269_v60 = vld [vmem:[%s4021_s0 + $0x8] sm:$0xf] }
 0x172   :  { %4143 = vst [vmem:[#allocation9_spill] sm:$0xff] %v3228_v38  ;;  %v657_v38 = vmul.f32 %v4153_v15, %v2938_v11  ;;  %v681_v5 = vadd.f32 %v649_v55, %v489_v63  ;;  %v3260_v54 = vadd.f32 %v652_v44, %v492_v56  ;;  %v661_v48 = vmul.f32 %v2953_v19, %v2938_v11 }
 0x173   :  { %v3244_v58 = vpop.permute.xlu0 %984  ;;  %v663_v51 = vmul.f32 %v2962_v0, %v2938_v11  ;;  %v683_v62 = vadd.f32 %v651_v8, %v3142_v7  ;;  %v3272_v2 = vadd.f32 %v654_v12, %v494_v14  ;;  %v3275_v31 = vadd.f32 %v653_v37, %v3148_v26  ;;  %v4157_v8 = vld [vmem:[#allocation46_spill] sm:$0xff]  ;;  %v4158_v37 = vld [vmem:[#allocation47_spill] sm:$0xff] }
 0x174   :  { %v3277_v56 = vadd.f32 %v656_v53, %v496_v4  ;;  %v3282_v19 = vadd.f32 %v655_v13, %v3156_v61  ;;  %v3284_v0 = vadd.f32 %v658_v43, %v498_v29  ;;  %v3287_v10 = vadd.f32 %v657_v38, %v3162_v17  ;;  %v4155_v38 = vld [vmem:[#allocation45_spill] sm:$0xff] }
 0x175   :  { %v3258_v47 = vpop.permute.xlu1 %964  ;;  %v665_v7 = vmul.f32 %v2971_v46, %v2938_v11  ;;  %v3291_v14 = vadd.f32 %v659_v41, %v499_v45  ;;  %v828_v26 = vmul.f32 %v2976_v33, %v3269_v60  ;;  %v827_v4 = vmul.f32 %v2979_v40, %v3269_v60  ;;  %v4154_v33 = vld [vmem:[#allocation44_spill] sm:$0xff] }
 0x176   :  { %v831_v61 = vmul.f32 %v2982_v42, %v3269_v60  ;;  %v3301_v29 = vadd.f32 %v661_v48, %v501_v3  ;;  %v3303_v17 = vadd.f32 %v663_v51, %v503_v34  ;;  %v829_v11 = vmul.f32 %v2985_v28, %v3269_v60 }
 0x177   :  { %v3279_v63 = vpop.permute.xlu0 %992  ;;  %v833_v46 = vmul.f32 %v2988_v21, %v3269_v60  ;;  %v830_v45 = vmul.f32 %v4154_v33, %v3269_v60  ;;  %v835_v40 = vmul.f32 %v2994_v57, %v3269_v60  ;;  %v832_v42 = vmul.f32 %v2997_v27, %v3269_v60  ;;  %v4156_v27 = vld [vmem:[#allocation7_spill] sm:$0xff]  ;;  %v4166_v33 = vld [vmem:[#allocation52_spill] sm:$0xff] }
 0x178   :  { %v837_v3 = vmul.f32 %v3000_v1, %v3269_v60  ;;  %v3320_v49 = vadd.f32 %v665_v7, %v3196_v39  ;;  %v834_v28 = vmul.f32 %v3003_v23, %v3269_v60  ;;  %v839_v21 = vmul.f32 %v3006_v24, %v3269_v60 }
 0x179   :  { %v3299_v9 = vpop.permute.xlu1 %972  ;;  %v836_v57 = vmul.f32 %v4155_v38, %v3269_v60  ;;  %v860_v55 = vadd.f32 %v828_v26, %v3204_v18  ;;  %v3330_v44 = vadd.f32 %v827_v4, %v4156_v27  ;;  %v3332_v1 = vadd.f32 %v831_v61, %v671_v36  ;;  %v4159_v18 = vld [vmem:[#allocation48_spill] sm:$0xff]  ;;  %v4164_v61 = vld [vmem:[#allocation51_spill] sm:$0xff]  ;;  %v4171_v27 = vld [vmem:[#allocation69_spill] sm:$0xff] }
 0x17a   :  { %v841_v39 = vmul.f32 %v4157_v8, %v3269_v60  ;;  %v3339_v23 = vadd.f32 %v829_v11, %v3208_v32  ;;  %v3342_v24 = vadd.f32 %v833_v46, %v3216_v30  ;;  %v838_v53 = vmul.f32 %v4158_v37, %v3269_v60  ;;  %v4172_v37 = vld [vmem:[#allocation57_spill] sm:$0xff] }
 0x17b   :  { %v3317_v34 = vpop.permute.xlu0 %1000  ;;  %v843_v13 = vmul.f32 %v4159_v18, %v3269_v60  ;;  %v3349_v36 = vadd.f32 %v830_v45, %v3206_v16  ;;  %v3351_v43 = vadd.f32 %v835_v40, %v675_v20  ;;  %v3354_v15 = vadd.f32 %v832_v42, %v3210_v35  ;;  %v4161_v16 = vld [vmem:[#allocation67_spill] sm:$0xff]  ;;  %v4162_v35 = vld [vmem:[#allocation49_spill] sm:$0xff]  ;;  %v4173_v18 = vld [vmem:[#allocation58_spill] sm:$0xff] }
 0x17c   :  { %v3356_v41 = vadd.f32 %v837_v3, %v677_v25  ;;  %v3361_v30 = vadd.f32 %v834_v28, %v3214_v59  ;;  %v3363_v48 = vadd.f32 %v839_v21, %v679_v50  ;;  %v3366_v51 = vadd.f32 %v836_v57, %v3220_v22  ;;  %v4163_v25 = vld [vmem:[#allocation50_spill] sm:$0xff]  ;;  %v4167_v45 = vld [vmem:[#allocation53_spill] sm:$0xff]  ;;  %v3392_v42 = vld [vmem:[%s4021_s0 + $0xc] sm:$0xf] }
 0x17d   :  { %v3336_v12 = vpop.permute.xlu1 %980  ;;  %v858_v7 = vmul.f32 %v4161_v16, %v3269_v60  ;;  %v3370_v20 = vadd.f32 %v841_v39, %v681_v5  ;;  %v840_v26 = vmul.f32 %v4162_v35, %v3269_v60  ;;  %v845_v4 = vmul.f32 %v4163_v25, %v3269_v60  ;;  %v4165_v50 = vld [vmem:[#allocation10_spill] sm:$0xff]  ;;  %v4169_v21 = vld [vmem:[#allocation55_spill] sm:$0xff] }
 0x17e   :  { %v842_v59 = vmul.f32 %v4164_v61, %v3269_v60  ;;  %v3381_v46 = vadd.f32 %v838_v53, %v4165_v50  ;;  %v3383_v22 = vadd.f32 %v843_v13, %v683_v62  ;;  %v847_v5 = vmul.f32 %v4166_v33, %v3269_v60  ;;  %v4168_v3 = vld [vmem:[#allocation54_spill] sm:$0xff]  ;;  %v4170_v62 = vld [vmem:[#allocation56_spill] sm:$0xff]  ;;  %v4174_v16 = vld [vmem:[#allocation43_spill] sm:$0xff] }
 0x17f   :  { %v3358_v32 = vpop.permute.xlu0 %1008  ;;  %v844_v40 = vmul.f32 %v4167_v45, %v3269_v60  ;;  %v849_v28 = vmul.f32 %v4168_v3, %v3269_v60  ;;  %v846_v38 = vmul.f32 %v4169_v21, %v3269_v60  ;;  %v851_v57 = vmul.f32 %v4170_v62, %v3269_v60  ;;  %v4175_v45 = vld [vmem:[#allocation59_spill] sm:$0xff] }
 0x180   :  { %4160 = vst [vmem:[#allocation16_spill] sm:$0xff] %v3358_v32  ;;  %v1020_v8 = vmul.f32 %v4171_v27, %v3392_v42  ;;  %v848_v53 = vmul.f32 %v4172_v37, %v3269_v60  ;;  %v853_v13 = vmul.f32 %v4173_v18, %v3269_v60  ;;  %v890_v35 = vadd.f32 %v858_v7, %v4174_v16  ;;  %v4179_v27 = vld [vmem:[#allocation73_spill] sm:$0xff]  ;;  %v4180_v18 = vld [vmem:[#allocation62_spill] sm:$0xff] }
 0x181   :  { %v3378_v11 = vpop.permute.xlu1 %988  ;;  %v3409_v61 = vadd.f32 %v840_v26, %v3252_v6  ;;  %v3412_v50 = vadd.f32 %v845_v4, %v3275_v31  ;;  %v3415_v33 = vadd.f32 %v842_v59, %v3254_v52  ;;  %v850_v3 = vmul.f32 %v4175_v45, %v3269_v60  ;;  %v4176_v6 = vld [vmem:[#allocation60_spill] sm:$0xff]  ;;  %v4178_v4 = vld [vmem:[#allocation61_spill] sm:$0xff]  ;;  %v4186_v45 = vld [vmem:[#allocation75_spill] sm:$0xff] }
 0x182   :  { %v3422_v62 = vadd.f32 %v847_v5, %v3282_v19  ;;  %v3425_v7 = vadd.f32 %v844_v40, %v3260_v54  ;;  %v855_v26 = vmul.f32 %v4176_v6, %v3269_v60  ;;  %v3432_v52 = vadd.f32 %v849_v28, %v3287_v10 }
 0x183   :  { %v1017_v39 = vpop.permute.xlu0 %1016  ;;  %v852_v59 = vmul.f32 %v4178_v4, %v3269_v60  ;;  %v1052_v19 = vadd.f32 %v1020_v8, %v860_v55  ;;  %v3439_v5 = vadd.f32 %v846_v38, %v3272_v2  ;;  %v3442_v54 = vadd.f32 %v851_v57, %v3291_v14  ;;  %v4181_v55 = vld [vmem:[#allocation63_spill] sm:$0xff]  ;;  %v4183_v57 = vld [vmem:[#allocation66_spill] sm:$0xff] }
 0x184   :  { %v1050_v25 = vmul.f32 %v1017_v39, %v3392_v42  ;;  %v1023_v39 = vmul.f32 %v4179_v27, %v3392_v42  ;;  %v3445_v40 = vadd.f32 %v848_v53, %v3277_v56  ;;  %v3448_v37 = vadd.f32 %v853_v13, %v3301_v29  ;;  %v4182_v56 = vld [vmem:[#allocation64_spill] sm:$0xff]  ;;  %v4188_v27 = vld [vmem:[#allocation71_spill] sm:$0xff] }
 0x185   :  { %v3419_v21 = vpop.permute.xlu1 %996  ;;  %v3451_v28 = vadd.f32 %v850_v3, %v3284_v0  ;;  %v857_v16 = vmul.f32 %v4180_v18, %v3269_v60  ;;  %v854_v2 = vmul.f32 %v4181_v55, %v3269_v60  ;;  %v3460_v14 = vadd.f32 %v855_v26, %v3303_v17  ;;  %v4184_v0 = vld [vmem:[#allocation68_spill] sm:$0xff]  ;;  %v4187_v17 = vld [vmem:[#allocation70_spill] sm:$0xff] }
 0x186   :  { %v3429_v31 = vadd.f32 %v1050_v25, %v890_v35  ;;  %v1019_v29 = vmul.f32 %v4182_v56, %v3392_v42  ;;  %v1022_v53 = vmul.f32 %v4183_v57, %v3392_v42  ;;  %v1024_v13 = vmul.f32 %v4184_v0, %v3392_v42  ;;  %v4185_v35 = vld [vmem:[#allocation40_spill] sm:$0xff]  ;;  %v4190_v55 = vld [vmem:[#allocation74_spill] sm:$0xff]  ;;  %v4191_v0 = vld [vmem:[#allocation41_spill] sm:$0xff] }
 0x187   :  { %v3469_v25 = vadd.f32 %v852_v59, %v4185_v35  ;;  %v1025_v3 = vmul.f32 %v4186_v45, %v3392_v42  ;;  %v1055_v4 = vadd.f32 %v1023_v39, %v3332_v1  ;;  %v1026_v26 = vmul.f32 %v4187_v17, %v3392_v42  ;;  %v4192_v1 = vld [vmem:[#allocation79_spill] sm:$0xff]  ;;  %v4193_v17 = vld [vmem:[#allocation76_spill] sm:$0xff] }
 0x188   :  { %4177 = vst [vmem:[#allocation17_spill] sm:$0xff] %v3429_v31  ;;  %v1089_v10 = vpop.permute.xlu0 %1088  ;;  %v1030_v56 = vmul.f32 %v4190_v55, %v3392_v42  ;;  %v3483_v57 = vadd.f32 %v857_v16, %v3320_v49  ;;  %v1054_v31 = vadd.f32 %v1022_v53, %v3349_v36  ;;  %v3496_v55 = vadd.f32 %v1024_v13, %v3354_v15  ;;  %v4194_v49 = vld [vmem:[#allocation77_spill] sm:$0xff] }
 0x189   :  { %v1212_v38 = vadd.f32 %v1089_v10, %v1052_v19  ;;  %v3457_v8 = vpop.permute.xlu1 %1004  ;;  %v1021_v19 = vmul.f32 %v4188_v27, %v3392_v42  ;;  %v4189_v10 = vld [vmem:[#allocation72_spill] sm:$0xff]  ;;  %v1032_v27 = vmul.f32 %v4193_v17, %v3392_v42  ;;  %v1027_v16 = vmul.f32 %v4194_v49, %v3392_v42 }
 0x18a   :  { %v1028_v18 = vmul.f32 %v4189_v10, %v3392_v42  ;;  %v1051_v10 = vadd.f32 %v1019_v29, %v3330_v44  ;;  %v3503_v32 = vadd.f32 %v1026_v26, %v3361_v30  ;;  %v3509_v36 = vadd.f32 %v1030_v56, %v3381_v46  ;;  %v4198_v49 = vld [vmem:[#allocation4_spill] sm:$0xff] }
 0x18b   :  { %v1244_v6 = vmax.f32 %v1212_v38, 0.0  ;;  %v3486_v38 = vadd.f32 %v854_v2, %v4191_v0 }
 0x18c   :  { %v1101_v59 = vpop.permute.xlu0 %1100  ;;  %v3506_v44 = vadd.f32 %v1028_v18, %v3366_v51  ;;  %v3519_v51 = vadd.f32 %v1032_v27, %v3409_v61 }
 0x18d   :  { %v1321_v39 = vrot.slane %v1244_v6, %v4192_v1  ;;  %v1215_v35 = vadd.f32 %v1101_v59, %v1055_v4  ;;  %v3489_v45 = vpop.permute.xlu1 %1012  ;;  %v1057_v6 = vadd.f32 %v1025_v3, %v3342_v24  ;;  %v1053_v59 = vadd.f32 %v1021_v19, %v3339_v23  ;;  %v4195_v24 = vld [vmem:[#allocation78_spill] sm:$0xff]  ;;  %v4196_v23 = vld [vmem:[#allocation80_spill] sm:$0xff] }
 0x18e   :  { %v1034_v3 = vmul.f32 %v4195_v24, %v3392_v42  ;;  %v1029_v30 = vmul.f32 %v4196_v23, %v3392_v42 }
 0x18f   :  { %v1322_v2 = vcombine.high %v1321_v39, %v1321_v39  ;;  %v1247_v0 = vmax.f32 %v1215_v35, 0.0  ;;  %v1633_v53 = vsel %vm1627_vm0, %v1321_v39, 0.0  ;;  %v1059_v35 = vadd.f32 %v1027_v16, %v3351_v43  ;;  %v4197_v39 = vld [vmem:[#allocation81_spill] sm:$0xff]  ;;  %v4200_v43 = vld [vmem:[#allocation6_spill] sm:$0xff] }
 0x190   :  { %v1109_v4 = vpop.permute.xlu0 %1108  ;;  %v1036_v17 = vmul.f32 %v4197_v39, %v3392_v42  ;;  %v1033_v16 = vmul.f32 %v4200_v43, %v3392_v42  ;;  %v1061_v24 = vadd.f32 %v1029_v30, %v3356_v41 }
 0x191   :  { %v1345_v15 = vrot.slane %v1247_v0, %v4192_v1  ;;  %v1217_v29 = vadd.f32 %v1109_v4, %v1057_v6  ;;  %v1634_v13 = vsel %vm1627_vm0, %v1322_v2, 0.0  ;;  %v1031_v2 = vmul.f32 %v4198_v49, %v3392_v42  ;;  %v4199_v0 = vld [vmem:[#allocation5_spill] sm:$0xff] }
 0x192   :  { %v1085_v26 = vpop.permute.xlu1 %1084  ;;  %v1635_v19 = vadd.f32 %v1634_v13, %v1633_v53  ;;  %v1038_v6 = vmul.f32 %v4199_v0, %v3392_v42  ;;  %v3542_v0 = vadd.f32 %v1036_v17, %v3425_v7 }
 0x193   :  { %v1346_v46 = vcombine.high %v1345_v15, %v1345_v15  ;;  %v1249_v18 = vmax.f32 %v1217_v29, 0.0  ;;  %v1211_v56 = vadd.f32 %v1085_v26, %v1051_v10  ;;  %v1648_v53 = vsel %vm1627_vm0, %v1345_v15, 0.0 }
 0x194   :  { %v1117_v4 = vpop.permute.xlu0 %1116  ;;  %1636 = vadd.xlane.f32.xlu1 %v1635_v19  ;;  %v3535_v26 = vadd.f32 %v1034_v3, %v3415_v33  ;;  %v3545_v41 = vadd.f32 %v1038_v6, %v3439_v5 }
 0x195   :  { %v1361_v61 = vrot.slane %v1249_v18, %v4192_v1  ;;  %v1243_v27 = vmax.f32 %v1211_v56, 0.0  ;;  %v1219_v29 = vadd.f32 %v1117_v4, %v1059_v35  ;;  %v1649_v10 = vsel %vm1627_vm0, %v1346_v46, 0.0  ;;  %v4201_v18 = vld [vmem:[#allocation8_spill] sm:$0xff] }
 0x196   :  { %v1093_v13 = vpop.permute.xlu1 %1092  ;;  %v1650_v23 = vadd.f32 %v1649_v10, %v1648_v53  ;;  %v1040_v56 = vmul.f32 %v4201_v18, %v3392_v42  ;;  %v1063_v46 = vadd.f32 %v1031_v2, %v3363_v48  ;;  %v1065_v48 = vadd.f32 %v1033_v16, %v3370_v20 }
 0x197   :  { %v1362_v39 = vcombine.high %v1361_v61, %v1361_v61  ;;  %v1313_v19 = vrot.slane %v1243_v27, %v4192_v1  ;;  %v1251_v15 = vmax.f32 %v1219_v29, 0.0  ;;  %v1213_v49 = vadd.f32 %v1093_v13, %v1053_v59  ;;  %v4202_v59 = vld [vmem:[#allocation9_spill] sm:$0xff] }
 0x198   :  { %v1125_v35 = vpop.permute.xlu0 %1124  ;;  %1651 = vadd.xlane.f32.xlu1 %v1650_v23  ;;  %v1035_v53 = vmul.f32 %v4202_v59, %v3392_v42  ;;  %v1658_v29 = vsel %vm1627_vm0, %v1361_v61, 0.0  ;;  %v3557_v23 = vadd.f32 %v1040_v56, %v3445_v40  ;;  %v3562_v20 = vmul.f32 %v3244_v58, %v3392_v42 }
 0x199   :  { %v1314_v33 = vcombine.high %v1313_v19, %v1313_v19  ;;  %v1377_v3 = vrot.slane %v1251_v15, %v4192_v1  ;;  %v1245_v30 = vmax.f32 %v1213_v49, 0.0  ;;  %v1221_v4 = vadd.f32 %v1125_v35, %v1061_v24 }
 0x19a   :  { %v1097_v27 = vpop.permute.xlu1 %1096  ;;  %v1659_v10 = vsel %vm1627_vm0, %v1362_v39, 0.0  ;;  %v1628_v13 = vsel %vm1627_vm0, %v1313_v19, 0.0  ;;  %v1067_v59 = vadd.f32 %v1035_v53, %v3383_v22  ;;  %v1039_v53 = vmul.f32 %v3299_v9, %v3392_v42 }
 0x19b   :  { %v1378_v7 = vcombine.high %v1377_v3, %v1377_v3  ;;  %v1329_v17 = vrot.slane %v1245_v30, %v4192_v1  ;;  %v1253_v5 = vmax.f32 %v1221_v4, 0.0  ;;  %v1214_v2 = vadd.f32 %v1097_v27, %v1054_v31 }
 0x19c   :  { %v1133_v6 = vpop.permute.xlu0 %1132  ;;  %v1660_v43 = vadd.f32 %v1659_v10, %v1658_v29  ;;  %v1629_v24 = vsel %vm1627_vm0, %v1314_v33, 0.0  ;;  %v1668_v18 = vsel %vm1627_vm0, %v1377_v3, 0.0 }
 0x19d   :  { %v1330_v15 = vcombine.high %v1329_v17, %v1329_v17  ;;  %v1393_v61 = vrot.slane %v1253_v5, %v4192_v1  ;;  %v1246_v39 = vmax.f32 %v1214_v2, 0.0  ;;  %v1223_v49 = vadd.f32 %v1133_v6, %v1063_v46 }
 0x19e   :  { %1661 = vadd.xlane.f32.xlu1 %v1660_v43  ;;  %v1105_v31 = vpop.permute.xlu1 %1104  ;;  %v1630_v16 = vadd.f32 %v1629_v24, %v1628_v13  ;;  %v1669_v19 = vsel %vm1627_vm0, %v1378_v7, 0.0  ;;  %v1638_v4 = vsel %vm1627_vm0, %v1329_v17, 0.0  ;;  %v1037_v7 = vmul.f32 %v3258_v47, %v3392_v42 }
 0x19f   :  { %v1394_v35 = vcombine.high %v1393_v61, %v1393_v61  ;;  %v1337_v40 = vrot.slane %v1246_v39, %v4192_v1  ;;  %v1255_v56 = vmax.f32 %v1223_v49, 0.0  ;;  %v1216_v33 = vadd.f32 %v1105_v31, %v3496_v55 }
 0x1a0   :  { %1631 = vadd.xlane.f32.xlu0 %v1630_v16  ;;  %v1141_v30 = vpop.permute.xlu0 %1140  ;;  %v1670_v46 = vadd.f32 %v1669_v19, %v1668_v18  ;;  %v1639_v58 = vsel %vm1627_vm0, %v1330_v15, 0.0  ;;  %v1678_v2 = vsel %vm1627_vm0, %v1393_v61, 0.0 }
 0x1a1   :  { %v1338_v27 = vcombine.high %v1337_v40, %v1337_v40  ;;  %v1409_v3 = vrot.slane %v1255_v56, %v4192_v1  ;;  %v1248_v29 = vmax.f32 %v1216_v33, 0.0  ;;  %v1225_v10 = vadd.f32 %v1141_v30, %v1065_v48 }
 0x1a2   :  { %1671 = vadd.xlane.f32.xlu1 %v1670_v46  ;;  %v1113_v5 = vpop.permute.xlu1 %1112  ;;  %v1640_v55 = vadd.f32 %v1639_v58, %v1638_v4  ;;  %v1679_v6 = vsel %vm1627_vm0, %v1394_v35, 0.0  ;;  %v1643_v47 = vsel %vm1627_vm0, %v1337_v40, 0.0 }
 0x1a3   :  { %v1410_v17 = vcombine.high %v1409_v3, %v1409_v3  ;;  %v1353_v43 = vrot.slane %v1248_v29, %v4192_v1  ;;  %v1257_v13 = vmax.f32 %v1225_v10, 0.0  ;;  %v1218_v22 = vadd.f32 %v1113_v5, %v3503_v32 }
 0x1a4   :  { %1641 = vadd.xlane.f32.xlu0 %v1640_v55  ;;  %v1149_v48 = vpop.permute.xlu0 %1148  ;;  %v1680_v24 = vadd.f32 %v1679_v6, %v1678_v2  ;;  %v1644_v15 = vsel %vm1627_vm0, %v1338_v27, 0.0  ;;  %v1069_v32 = vadd.f32 %v1037_v7, %v3412_v50  ;;  %v1688_v19 = vsel %vm1627_vm0, %v1409_v3, 0.0 }
 0x1a5   :  { %v1354_v39 = vcombine.high %v1353_v43, %v1353_v43  ;;  %v1425_v61 = vrot.slane %v1257_v13, %v4192_v1  ;;  %v1250_v49 = vmax.f32 %v1218_v22, 0.0  ;;  %v1227_v31 = vadd.f32 %v1149_v48, %v1067_v59 }
 0x1a6   :  { %1681 = vadd.xlane.f32.xlu1 %v1680_v24  ;;  %v1121_v16 = vpop.permute.xlu1 %1120  ;;  %v1645_v18 = vadd.f32 %v1644_v15, %v1643_v47  ;;  %v1689_v9 = vsel %vm1627_vm0, %v1410_v17, 0.0  ;;  %v1653_v4 = vsel %vm1627_vm0, %v1353_v43, 0.0  ;;  %v1071_v59 = vadd.f32 %v1039_v53, %v3422_v62 }
 0x1a7   :  { %v1426_v35 = vcombine.high %v1425_v61, %v1425_v61  ;;  %v1369_v56 = vrot.slane %v1250_v49, %v4192_v1  ;;  %v1259_v40 = vmax.f32 %v1227_v31, 0.0  ;;  %v1220_v33 = vadd.f32 %v1121_v16, %v3506_v44 }
 0x1a8   :  { %1646 = vadd.xlane.f32.xlu0 %v1645_v18  ;;  %v1157_v30 = vpop.permute.xlu0 %1156  ;;  %v1690_v46 = vadd.f32 %v1689_v9, %v1688_v19  ;;  %v1654_v58 = vsel %vm1627_vm0, %v1354_v39, 0.0  ;;  %v1041_v10 = vmul.f32 %v3336_v12, %v3392_v42  ;;  %v1698_v5 = vsel %vm1627_vm0, %v1425_v61, 0.0 }
 0x1a9   :  { %v1370_v50 = vcombine.high %v1369_v56, %v1369_v56  ;;  %v1441_v27 = vrot.slane %v1259_v40, %v4192_v1  ;;  %v1252_v3 = vmax.f32 %v1220_v33, 0.0  ;;  %v1229_v29 = vadd.f32 %v1157_v30, %v1069_v32 }
 0x1aa   :  { %1691 = vadd.xlane.f32.xlu1 %v1690_v46  ;;  %v1129_v7 = vpop.permute.xlu1 %1128  ;;  %v1655_v44 = vadd.f32 %v1654_v58, %v1653_v4  ;;  %v1699_v55 = vsel %vm1627_vm0, %v1426_v35, 0.0  ;;  %v1043_v43 = vmul.f32 %v3378_v11, %v3392_v42  ;;  %v1663_v12 = vsel %vm1627_vm0, %v1369_v56, 0.0 }
 0x1ab   :  { %v1442_v2 = vcombine.high %v1441_v27, %v1441_v27  ;;  %v1385_v6 = vrot.slane %v1252_v3, %v4192_v1  ;;  %v1261_v17 = vmax.f32 %v1229_v29, 0.0  ;;  %v1222_v62 = vadd.f32 %v1129_v7, %v3509_v36 }
 0x1ac   :  { %1656 = vadd.xlane.f32.xlu0 %v1655_v44  ;;  %v1165_v13 = vpop.permute.xlu0 %1164  ;;  %v1700_v22 = vadd.f32 %v1699_v55, %v1698_v5  ;;  %v1664_v53 = vsel %vm1627_vm0, %v1370_v50, 0.0  ;;  %v1073_v36 = vadd.f32 %v1041_v10, %v3432_v52  ;;  %v1708_v49 = vsel %vm1627_vm0, %v1441_v27, 0.0 }
 0x1ad   :  { %v1386_v48 = vcombine.high %v1385_v6, %v1385_v6  ;;  %v1457_v24 = vrot.slane %v1261_v17, %v4192_v1  ;;  %v1254_v47 = vmax.f32 %v1222_v62, 0.0  ;;  %v1231_v15 = vadd.f32 %v1165_v13, %v1071_v59 }
 0x1ae   :  { %1701 = vadd.xlane.f32.xlu1 %v1700_v22  ;;  %v1137_v39 = vpop.permute.xlu1 %1136  ;;  %v1665_v61 = vadd.f32 %v1664_v53, %v1663_v12  ;;  %v1709_v11 = vsel %vm1627_vm0, %v1442_v2, 0.0  ;;  %v1673_v35 = vsel %vm1627_vm0, %v1385_v6, 0.0  ;;  %v1075_v40 = vadd.f32 %v1043_v43, %v3442_v54 }
 0x1af   :  { %v1458_v31 = vcombine.high %v1457_v24, %v1457_v24  ;;  %v1401_v16 = vrot.slane %v1254_v47, %v4192_v1  ;;  %v1263_v18 = vmax.f32 %v1231_v15, 0.0  ;;  %v1224_v32 = vadd.f32 %v1137_v39, %v3519_v51 }
 0x1b0   :  { %1666 = vadd.xlane.f32.xlu0 %v1665_v61  ;;  %v1173_v19 = vpop.permute.xlu0 %1172  ;;  %v1710_v9 = vadd.f32 %v1709_v11, %v1708_v49  ;;  %v1674_v56 = vsel %vm1627_vm0, %v1386_v48, 0.0  ;;  %v1045_v4 = vmul.f32 %v3419_v21, %v3392_v42  ;;  %v1718_v59 = vsel %vm1627_vm0, %v1457_v24, 0.0 }
 0x1b1   :  { %v1402_v52 = vcombine.high %v1401_v16, %v1401_v16  ;;  %v1473_v33 = vrot.slane %v1263_v18, %v4192_v1  ;;  %v1256_v30 = vmax.f32 %v1224_v32, 0.0  ;;  %v1233_v46 = vadd.f32 %v1173_v19, %v1073_v36 }
 0x1b2   :  { %1711 = vadd.xlane.f32.xlu1 %v1710_v9  ;;  %v1145_v58 = vpop.permute.xlu1 %1144  ;;  %v1675_v51 = vadd.f32 %v1674_v56, %v1673_v35  ;;  %v1719_v50 = vsel %vm1627_vm0, %v1458_v31, 0.0  ;;  %v1047_v10 = vmul.f32 %v3457_v8, %v3392_v42  ;;  %v1683_v21 = vsel %vm1627_vm0, %v1401_v16, 0.0 }
 0x1b3   :  { %v1474_v27 = vcombine.high %v1473_v33, %v1473_v33  ;;  %v1417_v3 = vrot.slane %v1256_v30, %v4192_v1  ;;  %v1265_v29 = vmax.f32 %v1233_v46, 0.0  ;;  %v1226_v54 = vadd.f32 %v1145_v58, %v3535_v26 }
 0x1b4   :  { %1676 = vadd.xlane.f32.xlu0 %v1675_v51  ;;  %v1181_v7 = vpop.permute.xlu0 %1180  ;;  %v1720_v44 = vadd.f32 %v1719_v50, %v1718_v59  ;;  %v1684_v5 = vsel %vm1627_vm0, %v1402_v52, 0.0  ;;  %v1077_v26 = vadd.f32 %v1045_v4, %v3448_v37  ;;  %v1728_v13 = vsel %vm1627_vm0, %v1473_v33, 0.0 }
 0x1b5   :  { %v1418_v55 = vcombine.high %v1417_v3, %v1417_v3  ;;  %v1489_v2 = vrot.slane %v1265_v29, %v4192_v1  ;;  %v1258_v6 = vmax.f32 %v1226_v54, 0.0  ;;  %v1235_v17 = vadd.f32 %v1181_v7, %v1075_v40 }
 0x1b6   :  { %1721 = vadd.xlane.f32.xlu1 %v1720_v44  ;;  %v1153_v62 = vpop.permute.xlu1 %1152  ;;  %v1685_v43 = vadd.f32 %v1684_v5, %v1683_v21  ;;  %v1729_v8 = vsel %vm1627_vm0, %v1474_v27, 0.0  ;;  %v1693_v15 = vsel %vm1627_vm0, %v1417_v3, 0.0  ;;  %v1079_v61 = vadd.f32 %v1047_v10, %v3460_v14 }
 0x1b7   :  { %v1490_v22 = vcombine.high %v1489_v2, %v1489_v2  ;;  %v1433_v12 = vrot.slane %v1258_v6, %v4192_v1  ;;  %v1267_v53 = vmax.f32 %v1235_v17, 0.0  ;;  %v1228_v48 = vadd.f32 %v1153_v62, %v3542_v0 }
 0x1b8   :  { %1686 = vadd.xlane.f32.xlu0 %v1685_v43  ;;  %v1189_v24 = vpop.permute.xlu0 %1188  ;;  %v1730_v47 = vadd.f32 %v1729_v8, %v1728_v13  ;;  %v1694_v39 = vsel %vm1627_vm0, %v1418_v55, 0.0  ;;  %v1049_v31 = vmul.f32 %v3489_v45, %v3392_v42  ;;  %v1738_v18 = vsel %vm1627_vm0, %v1489_v2, 0.0 }
 0x1b9   :  { %v1434_v37 = vcombine.high %v1433_v12, %v1433_v12  ;;  %v1505_v36 = vrot.slane %v1267_v53, %v4192_v1  ;;  %v1260_v49 = vmax.f32 %v1228_v48, 0.0  ;;  %v1237_v11 = vadd.f32 %v1189_v24, %v1077_v26 }
 0x1ba   :  { %1731 = vadd.xlane.f32.xlu1 %v1730_v47  ;;  %v1161_v16 = vpop.permute.xlu1 %1160  ;;  %v1695_v0 = vadd.f32 %v1694_v39, %v1693_v15  ;;  %v1739_v32 = vsel %vm1627_vm0, %v1490_v22, 0.0  ;;  %v1703_v52 = vsel %vm1627_vm0, %v1433_v12, 0.0  ;;  %v1074_v33 = vadd.f32 %v3562_v20, %v3451_v28  ;;  %v4203_v39 = vld [vmem:[#allocation65_spill] sm:$0xff] }
 0x1bb   :  { %v1506_v19 = vcombine.high %v1505_v36, %v1505_v36  ;;  %v1449_v9 = vrot.slane %v1260_v49, %v4192_v1  ;;  %v1269_v35 = vmax.f32 %v1237_v11, 0.0  ;;  %v1230_v14 = vadd.f32 %v1161_v16, %v3545_v41 }
 0x1bc   :  { %1696 = vadd.xlane.f32.xlu0 %v1695_v0  ;;  %v1197_v56 = vpop.permute.xlu0 %1196  ;;  %v1740_v40 = vadd.f32 %v1739_v32, %v1738_v18  ;;  %v1704_v45 = vsel %vm1627_vm0, %v1434_v37, 0.0  ;;  %v1081_v41 = vadd.f32 %v1049_v31, %v3483_v57  ;;  %v1748_v50 = vsel %vm1627_vm0, %v1505_v36, 0.0  ;;  %v4204_v18 = vld [vmem:[#allocation16_spill] sm:$0xff] }
 0x1bd   :  { %v1450_v30 = vcombine.high %v1449_v9, %v1449_v9  ;;  %v1521_v46 = vrot.slane %v1269_v35, %v4192_v1  ;;  %v1262_v4 = vmax.f32 %v1230_v14, 0.0  ;;  %v1239_v58 = vadd.f32 %v1197_v56, %v1079_v61 }
 0x1be   :  { %1741 = vadd.xlane.f32.xlu1 %v1740_v40  ;;  %v1169_v51 = vpop.permute.xlu1 %1168  ;;  %v1705_v59 = vadd.f32 %v1704_v45, %v1703_v52  ;;  %v1749_v27 = vsel %vm1627_vm0, %v1506_v19, 0.0  ;;  %v1044_v20 = vmul.f32 %v3279_v63, %v3392_v42  ;;  %v1713_v44 = vsel %vm1627_vm0, %v1449_v9, 0.0  ;;  %v4205_v40 = vld [vmem:[#allocation42_spill] sm:$0xff] }
 0x1bf   :  { %v1522_v3 = vcombine.high %v1521_v46, %v1521_v46  ;;  %v1465_v29 = vrot.slane %v1262_v4, %v4192_v1  ;;  %v1271_v54 = vmax.f32 %v1239_v58, 0.0  ;;  %v1232_v28 = vadd.f32 %v1169_v51, %v3557_v23 }
 0x1c0   :  { %1706 = vadd.xlane.f32.xlu0 %v1705_v59  ;;  %v1205_v10 = vpop.permute.xlu0 %1204  ;;  %v1750_v7 = vadd.f32 %v1749_v27, %v1748_v50  ;;  %v1714_v57 = vsel %vm1627_vm0, %v1450_v30, 0.0  ;;  %v1046_v6 = vmul.f32 %v3317_v34, %v3392_v42  ;;  %v1758_v63 = vsel %vm1627_vm0, %v1521_v46, 0.0 }
 0x1c1   :  { %v1466_v21 = vcombine.high %v1465_v29, %v1465_v29  ;;  %v1537_v5 = vrot.slane %v1271_v54, %v4192_v1  ;;  %v1264_v55 = vmax.f32 %v1232_v28, 0.0  ;;  %v1241_v2 = vadd.f32 %v1205_v10, %v1081_v41 }
 0x1c2   :  { %1751 = vadd.xlane.f32.xlu1 %v1750_v7  ;;  %v1177_v23 = vpop.permute.xlu1 %1176  ;;  %v1715_v17 = vadd.f32 %v1714_v57, %v1713_v44  ;;  %v1759_v62 = vsel %vm1627_vm0, %v1522_v3, 0.0  ;;  %v1076_v12 = vadd.f32 %v1044_v20, %v3469_v25  ;;  %v1723_v53 = vsel %vm1627_vm0, %v1465_v29, 0.0  ;;  %v4206_v57 = vld [vmem:[#allocation17_spill] sm:$0xff] }
 0x1c3   :  { %v1538_v43 = vcombine.high %v1537_v5, %v1537_v5  ;;  %v1481_v26 = vrot.slane %v1264_v55, %v4192_v1  ;;  %v1273_v13 = vmax.f32 %v1241_v2, 0.0  ;;  %v1234_v8 = vadd.f32 %v1177_v23, %v1074_v33 }
 0x1c4   :  { %1716 = vadd.xlane.f32.xlu0 %v1715_v17  ;;  %v1760_v22 = vadd.f32 %v1759_v62, %v1758_v63  ;;  %v1724_v34 = vsel %vm1627_vm0, %v1466_v21, 0.0  ;;  %v856_v61 = vmul.f32 %v4203_v39, %v3269_v60  ;;  %v1768_v36 = vsel %vm1627_vm0, %v1537_v5, 0.0 }
 0x1c5   :  { %v1482_v48 = vcombine.high %v1481_v26, %v1481_v26  ;;  %v1553_v24 = vrot.slane %v1273_v13, %v4192_v1  ;;  %v1266_v47 = vmax.f32 %v1234_v8, 0.0  ;;  %v1725_v15 = vadd.f32 %v1724_v34, %v1723_v53  ;;  %v2532_v53 = vld [vmem:[%s4020_s1 + $0x18] sm:$0xff] }
 0x1c6   :  { %1761 = vadd.xlane.f32.xlu1 %v1760_v22  ;;  %v1185_v37 = vpop.permute.xlu1 %1184  ;;  %v1769_v49 = vsel %vm1627_vm0, %v1538_v43, 0.0  ;;  %v1078_v25 = vadd.f32 %v1046_v6, %v3486_v38  ;;  %v1048_v32 = vmul.f32 %v4204_v18, %v3392_v42  ;;  %v1733_v19 = vsel %vm1627_vm0, %v1481_v26, 0.0 }
 0x1c7   :  { %v1554_v11 = vcombine.high %v1553_v24, %v1553_v24  ;;  %v1497_v31 = vrot.slane %v1266_v47, %v4192_v1  ;;  %v1236_v16 = vadd.f32 %v1185_v37, %v1076_v12  ;;  %v1770_v0 = vadd.f32 %v1769_v49, %v1768_v36  ;;  %v2530_v12 = vld [vmem:[%s4020_s1] sm:$0xff] }
 0x1c8   :  { %1726 = vadd.xlane.f32.xlu0 %v1725_v15  ;;  %v1734_v60 = vsel %vm1627_vm0, %v1482_v48, 0.0  ;;  %v1778_v9 = vsel %vm1627_vm0, %v1553_v24, 0.0  ;;  %v888_v52 = vadd.f32 %v856_v61, %v4205_v40  ;;  %v2542_v34 = vmov 6   ;;  %v2533_v48 = vld [vmem:[%s4020_s1 + $0x8] sm:$0xff] }
 0x1c9   :  { %v1498_v35 = vcombine.high %v1497_v31, %v1497_v31  ;;  %v1268_v14 = vmax.f32 %v1236_v16, 0.0  ;;  %v1735_v56 = vadd.f32 %v1734_v60, %v1733_v19  ;;  %v1779_v38 = vsel %vm1627_vm0, %v1554_v11, 0.0 }
 0x1ca   :  { %1771 = vadd.xlane.f32.xlu1 %v1770_v0  ;;  %v1193_v45 = vpop.permute.xlu1 %1192  ;;  %v1780_v33 = vadd.f32 %v1779_v38, %v1778_v9  ;;  %v1743_v46 = vsel %vm1627_vm0, %v1497_v31, 0.0  ;;  %v1080_v41 = vadd.f32 %v1048_v32, %v888_v52  ;;  %v4207_v24 = vmov 0  }
 0x1cb   :  { %v1513_v30 = vrot.slane %v1268_v14, %v4192_v1  ;;  %v1238_v42 = vadd.f32 %v1193_v45, %v1078_v25  ;;  %v1744_v4 = vsel %vm1627_vm0, %v1498_v35, 0.0 }
 0x1cc   :  { %1736 = vadd.xlane.f32.xlu0 %v1735_v56  ;;  %v1745_v58 = vadd.f32 %v1744_v4, %v1743_v46 }
 0x1cd   :  { %v1514_v51 = vcombine.high %v1513_v30, %v1513_v30  ;;  %v1270_v59 = vmax.f32 %v1238_v42, 0.0  ;;  %v1753_v29 = vsel %vm1627_vm0, %v1513_v30, 0.0 }
 0x1ce   :  { %1781 = vadd.xlane.f32.xlu1 %v1780_v33  ;;  %v1201_v50 = vpop.permute.xlu1 %1200 }
 0x1cf   :  { %v1529_v27 = vrot.slane %v1270_v59, %v4192_v1  ;;  %v1240_v3 = vadd.f32 %v1201_v50, %v1080_v41  ;;  %v1754_v54 = vsel %vm1627_vm0, %v1514_v51, 0.0  ;;  %v4208_v59 = vld [vmem:[#allocation2_spill] sm:$0xff] }
 0x1d0   :  { %1746 = vadd.xlane.f32.xlu0 %v1745_v58  ;;  %v1755_v28 = vadd.f32 %v1754_v54, %v1753_v29  ;;  %v3755_v41 = vsub.s32 7, %v4208_v59  ;;  %v3758_v50 = vsub.s32 2, %v4208_v59  ;;  %v3767_v54 = vsub.s32 5, %v4208_v59 }
 0x1d1   :  { %v1530_v20 = vcombine.high %v1529_v27, %v1529_v27  ;;  %v1272_v10 = vmax.f32 %v1240_v3, 0.0  ;;  %v1763_v5 = vsel %vm1627_vm0, %v1529_v27, 0.0 }
 0x1d2   :  { %v1209_v7 = vpop.permute.xlu1 %1208 }
 0x1d3   :  { %v1545_v44 = vrot.slane %v1272_v10, %v4192_v1  ;;  %v1242_v21 = vadd.f32 %v1209_v7, %v4206_v57  ;;  %v1764_v55 = vsel %vm1627_vm0, %v1530_v20, 0.0  ;;  %v4209_v10 = vld [vmem:[#allocation3_spill] sm:$0xff] }
 0x1d4   :  { %1756 = vadd.xlane.f32.xlu0 %v1755_v28  ;;  %v1765_v2 = vadd.f32 %v1764_v55, %v1763_v5  ;;  %v3770_v28 = vsub.s32 1, %v4208_v59 }
 0x1d5   :  { %v1546_v6 = vcombine.high %v1545_v44, %v1545_v44  ;;  %v1274_v23 = vmax.f32 %v1242_v21, 0.0  ;;  %v1773_v63 = vsel %vm1627_vm0, %v1545_v44, 0.0 }
 0x1d7   :  { %v1561_v17 = vrot.slane %v1274_v23, %v4192_v1  ;;  %v1774_v62 = vsel %vm1627_vm0, %v1546_v6, 0.0  ;;  %v2531_v1 = vld [vmem:[%s4020_s1 + $0x10] sm:$0xff] }
 0x1d8   :  { %1766 = vadd.xlane.f32.xlu0 %v1765_v2  ;;  %v1775_v43 = vadd.f32 %v1774_v62, %v1773_v63  ;;  %v3785_v2 = vsub.s32 3, %v4208_v59 }
 0x1d9   :  { %v1562_v26 = vcombine.high %v1561_v17, %v1561_v17  ;;  %v1783_v13 = vsel %vm1627_vm0, %v1561_v17, 0.0 }
 0x1db   :  { %v1784_v8 = vsel %vm1627_vm0, %v1562_v26, 0.0 }
 0x1dc   :  { %1776 = vadd.xlane.f32.xlu0 %v1775_v43  ;;  %v1785_v22 = vadd.f32 %v1784_v8, %v1783_v13 }
 0x1df   :  { %1789 = vperm.xlu1 %2521, %v2530_v12  }
 0x1e0   :  { %1786 = vadd.xlane.f32.xlu0 %v1785_v22  ;;  %v3794_v22 = vsub.s32 4, %v4208_v59 }
 0x1e3   :  { %1795 = vperm.xlu1 %2521, %v2531_v1  }
 0x1e7   :  { %1798 = vperm.xlu1 %2521, %v2532_v53  }
 0x1eb   :  { %2523 = vset.pattern.permute.xlu1 %v2542_v34 }
 0x1ec   :  { %1993 = vperm.xlu1 %2523, %v2530_v12  }
 0x1f0   :  { %1996 = vperm.xlu1 %2523, %v2533_v48  }
 0x1f4   :  { %1999 = vperm.xlu1 %2523, %v2531_v1  }
 0x1f6   :  { %1792 = vperm.xlu0 %2522, %v2533_v48  }
 0x1f8   :  { %2002 = vperm.xlu1 %2523, %v2532_v53  }
 0x1fa   :  { %2525 = vset.pattern.permute.xlu0 %v4207_v24 }
 0x1fc   :  { %2524 = vset.pattern.permute.xlu1 %v4207_v24 }
 0x21d   :  { %v1637_v47 = vpop.xlane.xlu1 %1636 }
 0x221   :  { %v3704_v15 = vpop.xlane.xlu1 %1651 }
 0x227   :  { %v3706_v39 = vpop.xlane.xlu1 %1661 }
 0x229   :  { %v1632_v61 = vpop.xlane.xlu0 %1631 }
 0x22b   :  { %v3708_v37 = vpop.xlane.xlu1 %1671 }
 0x22d   :  { %v1642_v36 = vpop.xlane.xlu0 %1641 }
 0x22f   :  { %v3710_v49 = vpop.xlane.xlu1 %1681 }
 0x231   :  { %v3712_v25 = vpop.xlane.xlu0 %1646 }
 0x233   :  { %v3714_v11 = vpop.xlane.xlu1 %1691 }
 0x235   :  { %v1657_v31 = vpop.xlane.xlu0 %1656 }
 0x237   :  { %v3716_v16 = vpop.xlane.xlu1 %1701 }
 0x239   :  { %v1667_v0 = vpop.xlane.xlu0 %1666 }
 0x23b   :  { %v3718_v18 = vpop.xlane.xlu1 %1711 }
 0x23d   :  { %v3720_v32 = vpop.xlane.xlu0 %1676 }
 0x23f   :  { %v3722_v19 = vpop.xlane.xlu1 %1721 }
 0x241   :  { %v3724_v60 = vpop.xlane.xlu0 %1686 }
 0x243   :  { %v3726_v9 = vpop.xlane.xlu1 %1731 }
 0x245   :  { %v3728_v35 = vpop.xlane.xlu0 %1696 }
 0x247   :  { %v3730_v14 = vpop.xlane.xlu1 %1741 }
 0x249   :  { %v3732_v56 = vpop.xlane.xlu0 %1706 }
 0x24b   :  { %v3734_v38 = vpop.xlane.xlu1 %1751 }
 0x24d   :  { %v3736_v40 = vpop.xlane.xlu0 %1716 }
 0x24f   :  { %v3738_v52 = vpop.xlane.xlu1 %1761 }
 0x251   :  { %v3740_v45 = vpop.xlane.xlu0 %1726 }
 0x253   :  { %v3742_v33 = vpop.xlane.xlu1 %1771 }
 0x255   :  { %v3744_v30 = vpop.xlane.xlu0 %1736 }
 0x257   :  { %v3746_v42 = vpop.xlane.xlu1 %1781 }
 0x259   :  { %v1747_v46 = vpop.xlane.xlu0 %1746 }
 0x25b   :  { %v3748_v4 = vpop.permute.xlu1 %1789 }
 0x25c   :  { %v1803_v7 = vrot.slane %v3748_v4, %v4209_v10  ;;  %v1811_v44 = vrot.slane %v3748_v4, %v3758_v50  ;;  %v1807_v5 = vrot.slane %v3748_v4, %v3770_v28  ;;  %v1823_v55 = vrot.slane %v3748_v4, %v3767_v54 }
 0x25d   :  { %v3750_v58 = vpop.xlane.xlu0 %1756  ;;  %v1815_v8 = vrot.slane %v3748_v4, %v3785_v2  ;;  %v1831_v53 = vrot.slane %v3748_v4, %v3755_v41 }
 0x25e   :  { %v1960_v6 = vmul.f32 %v1803_v7, %v1632_v61  ;;  %v1962_v17 = vmul.f32 %v1811_v44, %v1642_v36  ;;  %v1961_v12 = vmul.f32 %v1807_v5, %v1637_v47  ;;  %v1965_v1 = vmul.f32 %v1823_v55, %v1657_v31 }
 0x25f   :  { %v3752_v51 = vpop.permute.xlu1 %1795  ;;  %v1963_v47 = vmul.f32 %v1815_v8, %v3712_v25  ;;  %v1967_v31 = vmul.f32 %v1831_v53, %v1667_v0 }
 0x260   :  { %v1895_v3 = vrot.slane %v3752_v51, %v3755_v41 }
 0x261   :  { %v3760_v27 = vpop.xlane.xlu0 %1766 }
 0x262   :  { %v3772_v20 = vmul.f32 %v1895_v3, %v1747_v46  ;;  %v1819_v46 = vrot.slane %v3748_v4, %v3794_v22  ;;  %v3805_v3 = vsub.s32 6, %v4208_v59 }
 0x263   :  { %v3764_v29 = vpop.permute.xlu1 %1798 }
 0x264   :  { %v1827_v25 = vrot.slane %v3748_v4, %v3805_v3 }
 0x265   :  { %v3778_v57 = vpop.xlane.xlu0 %1776 }
 0x266   :  { %v1966_v4 = vmul.f32 %v1827_v25, %v3706_v39 }
 0x267   :  { %v1994_v21 = vpop.permute.xlu1 %1993 }
 0x268   :  { %v2007_v23 = vrot.slane %v1994_v21, %v4209_v10  ;;  %v2015_v63 = vrot.slane %v1994_v21, %v3758_v50  ;;  %v2011_v26 = vrot.slane %v1994_v21, %v3770_v28  ;;  %v2027_v13 = vrot.slane %v1994_v21, %v3767_v54 }
 0x269   :  { %v3798_v34 = vpop.xlane.xlu0 %1786  ;;  %v2019_v61 = vrot.slane %v1994_v21, %v3785_v2  ;;  %v2035_v36 = vrot.slane %v1994_v21, %v3755_v41  ;;  %v2023_v5 = vrot.slane %v1994_v21, %v3794_v22 }
 0x26a   :  { %v2164_v62 = vadd.f32 %v2007_v23, %v1960_v6  ;;  %v2166_v43 = vadd.f32 %v2015_v63, %v1962_v17  ;;  %v2165_v48 = vadd.f32 %v2011_v26, %v1961_v12  ;;  %v2169_v24 = vadd.f32 %v2027_v13, %v1965_v1 }
 0x26b   :  { %v3808_v7 = vpop.permute.xlu1 %1996  ;;  %v2167_v55 = vadd.f32 %v2019_v61, %v1963_v47  ;;  %v2171_v6 = vadd.f32 %v2035_v36, %v1967_v31  ;;  %v1964_v63 = vmul.f32 %v1819_v46, %v3704_v15  ;;  %v2031_v26 = vrot.slane %v1994_v21, %v3805_v3 }
 0x26c   :  { %2229 = vperm.xlu1 %2524, %v2164_v62   ;;  %2235 = vperm.xlu0 %2525, %v2166_v43   ;;  %v2043_v62 = vrot.slane %v3808_v7, %v3770_v28  ;;  %v2059_v39 = vrot.slane %v3808_v7, %v3767_v54  ;;  %v2039_v61 = vrot.slane %v3808_v7, %v4209_v10 }
 0x26d   :  { %v2168_v43 = vadd.f32 %v2023_v5, %v1964_v63  ;;  %v2170_v53 = vadd.f32 %v2031_v26, %v1966_v4  ;;  %v1871_v36 = vrot.slane %v3752_v51, %v3770_v28 }
 0x26f   :  { %v3832_v1 = vpop.permute.xlu1 %1999 }
 0x270   :  { %2232 = vperm.xlu1 %2524, %v2165_v48   ;;  %2244 = vperm.xlu0 %2525, %v2169_v24   ;;  %v2075_v46 = vrot.slane %v3832_v1, %v3770_v28 }
 0x271   :  { %v3810_v44 = vpop.permute.xlu0 %1792 }
 0x272   :  { %v1839_v23 = vrot.slane %v3810_v44, %v3770_v28  ;;  %v1847_v17 = vrot.slane %v3810_v44, %v3785_v2  ;;  %v1855_v12 = vrot.slane %v3810_v44, %v3767_v54  ;;  %v1835_v15 = vrot.slane %v3810_v44, %v4209_v10 }
 0x273   :  { %v1843_v24 = vrot.slane %v3810_v44, %v3758_v50  ;;  %v1851_v31 = vrot.slane %v3810_v44, %v3794_v22  ;;  %v3849_v5 = vpop.permute.xlu1 %2002 }
 0x274   :  { %2238 = vperm.xlu1 %2524, %v2167_v55   ;;  %2250 = vperm.xlu0 %2525, %v2171_v6   ;;  %v1969_v0 = vmul.f32 %v1839_v23, %v3720_v32  ;;  %v1971_v8 = vmul.f32 %v1847_v17, %v3724_v60  ;;  %v2051_v32 = vrot.slane %v3808_v7, %v3785_v2 }
 0x275   :  { %v1973_v48 = vmul.f32 %v1855_v12, %v3728_v35  ;;  %v1968_v60 = vmul.f32 %v1835_v15, %v3708_v37  ;;  %v1970_v37 = vmul.f32 %v1843_v24, %v3710_v49  ;;  %v1977_v55 = vmul.f32 %v1871_v36, %v3736_v40 }
 0x276   :  { %v2173_v13 = vadd.f32 %v2043_v62, %v1969_v0  ;;  %v2175_v21 = vadd.f32 %v2051_v32, %v1971_v8  ;;  %v2047_v6 = vrot.slane %v3808_v7, %v3758_v50  ;;  %v1903_v23 = vrot.slane %v3764_v29, %v3770_v28 }
 0x277   :  { %v2177_v35 = vadd.f32 %v2059_v39, %v1973_v48  ;;  %v2172_v47 = vadd.f32 %v2039_v61, %v1968_v60  ;;  %v2181_v17 = vadd.f32 %v2075_v46, %v1977_v55  ;;  %v2107_v49 = vrot.slane %v3849_v5, %v3770_v28 }
 0x278   :  { %2241 = vperm.xlu1 %2524, %v2168_v43   ;;  %2256 = vperm.xlu0 %2525, %v2173_v13   ;;  %v2174_v63 = vadd.f32 %v2047_v6, %v1970_v37  ;;  %v1972_v25 = vmul.f32 %v1851_v31, %v3714_v11  ;;  %v1867_v0 = vrot.slane %v3752_v51, %v4209_v10 }
 0x279   :  { %v1985_v40 = vmul.f32 %v1903_v23, %v3750_v58  ;;  %v2055_v62 = vrot.slane %v3808_v7, %v3794_v22  ;;  %v1907_v43 = vrot.slane %v3764_v29, %v3758_v50  ;;  %v2111_v28 = vrot.slane %v3849_v5, %v3758_v50 }
 0x27a   :  { %v2071_v11 = vrot.slane %v3832_v1, %v4209_v10  ;;  %v1976_v8 = vmul.f32 %v1867_v0, %v3718_v18  ;;  %v1911_v12 = vrot.slane %v3764_v29, %v3785_v2  ;;  %v1899_v15 = vrot.slane %v3764_v29, %v4209_v10 }
 0x27b   :  { %v2189_v26 = vadd.f32 %v2107_v49, %v1985_v40  ;;  %v2176_v13 = vadd.f32 %v2055_v62, %v1972_v25  ;;  %v1986_v58 = vmul.f32 %v1907_v43, %v3738_v52  ;;  %v1875_v18 = vrot.slane %v3752_v51, %v3758_v50 }
 0x27c   :  { %2247 = vperm.xlu1 %2524, %v2170_v53   ;;  %2262 = vperm.xlu0 %2525, %v2175_v21   ;;  %v2180_v32 = vadd.f32 %v2071_v11, %v1976_v8  ;;  %v2115_v53 = vrot.slane %v3849_v5, %v3785_v2  ;;  %v2103_v21 = vrot.slane %v3849_v5, %v4209_v10 }
 0x27d   :  { %v2190_v4 = vadd.f32 %v2111_v28, %v1986_v58  ;;  %v1987_v52 = vmul.f32 %v1911_v12, %v3760_v27  ;;  %v1984_v48 = vmul.f32 %v1899_v15, %v3734_v38  ;;  %v1915_v60 = vrot.slane %v3764_v29, %v3794_v22 }
 0x27e   :  { %v2119_v61 = vrot.slane %v3849_v5, %v3794_v22  ;;  %v2079_v10 = vrot.slane %v3832_v1, %v3758_v50  ;;  %v1879_v36 = vrot.slane %v3752_v51, %v3785_v2  ;;  %v1919_v46 = vrot.slane %v3764_v29, %v3767_v54 }
 0x27f   :  { %v2191_v24 = vadd.f32 %v2115_v53, %v1987_v52  ;;  %v2188_v39 = vadd.f32 %v2103_v21, %v1984_v48  ;;  %v1988_v38 = vmul.f32 %v1915_v60, %v3742_v33  ;;  %v1978_v27 = vmul.f32 %v1875_v18, %v3722_v19 }
 0x280   :  { %2268 = vperm.xlu0 %2525, %v2177_v35   ;;  %2253 = vperm.xlu1 %2524, %v2172_v47   ;;  %v2123_v37 = vrot.slane %v3849_v5, %v3767_v54  ;;  %v2083_v50 = vrot.slane %v3832_v1, %v3785_v2  ;;  %v1891_v31 = vrot.slane %v3752_v51, %v3805_v3 }
 0x281   :  { %v2192_v35 = vadd.f32 %v2119_v61, %v1988_v38  ;;  %v2182_v47 = vadd.f32 %v2079_v10, %v1978_v27  ;;  %v1989_v55 = vmul.f32 %v1919_v46, %v3778_v57  ;;  %v1979_v6 = vmul.f32 %v1879_v36, %v3740_v45 }
 0x282   :  { %v1883_v19 = vrot.slane %v3752_v51, %v3794_v22  ;;  %v2095_v33 = vrot.slane %v3832_v1, %v3805_v3  ;;  %v2087_v2 = vrot.slane %v3832_v1, %v3794_v22  ;;  %v1982_v57 = vmul.f32 %v1891_v31, %v3730_v14 }
 0x283   :  { %v2193_v23 = vadd.f32 %v2123_v37, %v1989_v55  ;;  %v1887_v49 = vrot.slane %v3752_v51, %v3767_v54  ;;  %v2091_v25 = vrot.slane %v3832_v1, %v3767_v54  ;;  %v1859_v22 = vrot.slane %v3810_v44, %v3805_v3 }
 0x284   :  { %2280 = vperm.xlu0 %2525, %v2181_v17   ;;  %2259 = vperm.xlu1 %2524, %v2174_v63   ;;  %v2183_v17 = vadd.f32 %v2083_v50, %v1979_v6  ;;  %v1863_v63 = vrot.slane %v3810_v44, %v3755_v41  ;;  %v1980_v45 = vmul.f32 %v1883_v19, %v3726_v9 }
 0x285   :  { %v2186_v0 = vadd.f32 %v2095_v33, %v1982_v57  ;;  %v2067_v14 = vrot.slane %v3808_v7, %v3755_v41  ;;  %v1981_v9 = vmul.f32 %v1887_v49, %v3744_v30  ;;  %v1927_v51 = vrot.slane %v3764_v29, %v3755_v41 }
 0x286   :  { %v2184_v40 = vadd.f32 %v2087_v2, %v1980_v45  ;;  %v1975_v62 = vmul.f32 %v1863_v63, %v3732_v56  ;;  %v2131_v54 = vrot.slane %v3849_v5, %v3755_v41  ;;  %v1974_v56 = vmul.f32 %v1859_v22, %v3716_v16 }
 0x287   :  { %v2063_v44 = vrot.slane %v3808_v7, %v3805_v3  ;;  %v1923_v30 = vrot.slane %v3764_v29, %v3805_v3  ;;  %v2127_v8 = vrot.slane %v3849_v5, %v3805_v3  ;;  %v4210_v7 = vlaneseq }
 0x288   :  { %2304 = vperm.xlu0 %2525, %v2189_v26   ;;  %2265 = vperm.xlu1 %2524, %v2176_v13   ;;  %v2179_v43 = vadd.f32 %v2067_v14, %v1975_v62  ;;  %v2185_v26 = vadd.f32 %v2091_v25, %v1981_v9  ;;  %v1991_v13 = vmul.f32 %v1927_v51, %v3798_v34 }
 0x289   :  { %v2178_v11 = vadd.f32 %v2063_v44, %v1974_v56  ;;  %v1990_v58 = vmul.f32 %v1923_v30, %v3746_v42  ;;  %v2099_v34 = vrot.slane %v3832_v1, %v3755_v41  ;;  %v2325_v15 = vand.u32 127, %v4210_v7 }
 0x28a   :  { %v2195_v28 = vadd.f32 %v2131_v54, %v1991_v13 }
 0x28b   :  { %v2194_v16 = vadd.f32 %v2127_v8, %v1990_v58  ;;  %v2187_v12 = vadd.f32 %v2099_v34, %v3772_v20 }
 0x28c   :  { %2307 = vperm.xlu0 %2525, %v2190_v4   ;;  %2277 = vperm.xlu1 %2524, %v2180_v32   ;;  %v3942_v32 = vsub.s32 %v2325_v15, %v4208_v59 }
 0x290   :  { %2310 = vperm.xlu0 %2525, %v2191_v24   ;;  %2301 = vperm.xlu1 %2524, %v2188_v39  }
 0x294   :  { %2313 = vperm.xlu0 %2525, %v2192_v35   ;;  %2283 = vperm.xlu1 %2524, %v2182_v47  }
 0x298   :  { %2316 = vperm.xlu0 %2525, %v2193_v23   ;;  %2286 = vperm.xlu1 %2524, %v2183_v17  }
 0x29c   :  { %2295 = vperm.xlu0 %2525, %v2186_v0   ;;  %2289 = vperm.xlu1 %2524, %v2184_v40  }
 0x2a0   :  { %2274 = vperm.xlu0 %2525, %v2179_v43   ;;  %2292 = vperm.xlu1 %2524, %v2185_v26  }
 0x2a4   :  { %2322 = vperm.xlu0 %2525, %v2195_v28   ;;  %2271 = vperm.xlu1 %2524, %v2178_v11  }
 0x2a8   :  { %2319 = vperm.xlu1 %2524, %v2194_v16  }
 0x2ac   :  { %2298 = vperm.xlu1 %2524, %v2187_v12  }
 0x2e7   :  { %v2230_v29 = vpop.permute.xlu1 %2229  ;;  %v2236_v4 = vpop.permute.xlu0 %2235 }
 0x2e8   :  { %v2329_v42 = vrot.slane %v2230_v29, %v3942_v32  ;;  %v2337_v18 = vrot.slane %v2236_v4, %v3942_v32 }
 0x2eb   :  { %v2233_v3 = vpop.permute.xlu1 %2232  ;;  %v2245_v5 = vpop.permute.xlu0 %2244 }
 0x2ec   :  { %v2333_v53 = vrot.slane %v2233_v3, %v3942_v32  ;;  %v2349_v61 = vrot.slane %v2245_v5, %v3942_v32 }
 0x2ee   :  { %v2455_v1 = vsel %vm2454_vm1, %v2333_v53, %v2329_v42 }
 0x2ef   :  { %v2239_v21 = vpop.permute.xlu1 %2238  ;;  %v2251_v41 = vpop.permute.xlu0 %2250  ;;  %v2457_v48 = vsel %vm2456_vm2, %v2337_v18, %v2455_v1 }
 0x2f0   :  { %v2341_v20 = vrot.slane %v2239_v21, %v3942_v32  ;;  %v2357_v38 = vrot.slane %v2251_v41, %v3942_v32 }
 0x2f2   :  { %v2459_v24 = vsel %vm2458_vm3, %v2341_v20, %v2457_v48 }
 0x2f3   :  { %v2242_v59 = vpop.permute.xlu1 %2241  ;;  %v2257_v52 = vpop.permute.xlu0 %2256 }
 0x2f4   :  { %v2345_v60 = vrot.slane %v2242_v59, %v3942_v32  ;;  %v2365_v40 = vrot.slane %v2257_v52, %v3942_v32 }
 0x2f6   :  { %v2461_v39 = vsel %vm2460_vm4, %v2345_v60, %v2459_v24 }
 0x2f7   :  { %v2248_v10 = vpop.permute.xlu1 %2247  ;;  %v2263_v36 = vpop.permute.xlu0 %2262  ;;  %v2463_v27 = vsel %vm2462_vm5, %v2349_v61, %v2461_v39 }
 0x2f8   :  { %v2353_v46 = vrot.slane %v2248_v10, %v3942_v32  ;;  %v2373_v54 = vrot.slane %v2263_v36, %v3942_v32 }
 0x2fa   :  { %v2465_v35 = vsel %vm2464_vm6, %v2353_v46, %v2463_v27 }
 0x2fb   :  { %v2467_v47 = vsel %vm2466_vm7, %v2357_v38, %v2465_v35  ;;  %v2254_v37 = vpop.permute.xlu1 %2253  ;;  %v2269_v50 = vpop.permute.xlu0 %2268 }
 0x2fc   :  { %2494 = vst.msk [vmem:[%s4022_s2] sm:$0xff] %vm2493_vm8, %v2467_v47  ;;  %v2361_v25 = vrot.slane %v2254_v37, %v3942_v32  ;;  %v2381_v8 = vrot.slane %v2269_v50, %v3942_v32 }
 0x2fe   :  { %v2468_v9 = vsel %vm2454_vm1, %v2365_v40, %v2361_v25 }
 0x2ff   :  { %v2260_v31 = vpop.permute.xlu1 %2259  ;;  %v2281_v55 = vpop.permute.xlu0 %2280 }
 0x300   :  { %v2369_v0 = vrot.slane %v2260_v31, %v3942_v32  ;;  %v2397_v34 = vrot.slane %v2281_v55, %v3942_v32 }
 0x302   :  { %v2469_v51 = vsel %vm2456_vm2, %v2369_v0, %v2468_v9 }
 0x303   :  { %v2266_v6 = vpop.permute.xlu1 %2265  ;;  %v2305_v19 = vpop.permute.xlu0 %2304  ;;  %v2470_v44 = vsel %vm2458_vm3, %v2373_v54, %v2469_v51 }
 0x304   :  { %v2377_v43 = vrot.slane %v2266_v6, %v3942_v32  ;;  %v2429_v26 = vrot.slane %v2305_v19, %v3942_v32 }
 0x306   :  { %v2471_v11 = vsel %vm2460_vm4, %v2377_v43, %v2470_v44 }
 0x307   :  { %v2278_v33 = vpop.permute.xlu1 %2277  ;;  %v2308_v23 = vpop.permute.xlu0 %2307  ;;  %v2472_v5 = vsel %vm2462_vm5, %v2381_v8, %v2471_v11 }
 0x308   :  { %v2433_v30 = vrot.slane %v2308_v23, %v3942_v32  ;;  %v2393_v58 = vrot.slane %v2278_v33, %v3942_v32 }
 0x30a   :  { %v2475_v1 = vsel %vm2454_vm1, %v2397_v34, %v2393_v58 }
 0x30b   :  { %v2302_v17 = vpop.permute.xlu1 %2301  ;;  %v2311_v2 = vpop.permute.xlu0 %2310 }
 0x30c   :  { %v2425_v62 = vrot.slane %v2302_v17, %v3942_v32  ;;  %v2437_v12 = vrot.slane %v2311_v2, %v3942_v32 }
 0x30e   :  { %v2482_v56 = vsel %vm2454_vm1, %v2429_v26, %v2425_v62 }
 0x30f   :  { %v2284_v63 = vpop.permute.xlu1 %2283  ;;  %v2314_v57 = vpop.permute.xlu0 %2313  ;;  %v2483_v16 = vsel %vm2456_vm2, %v2433_v30, %v2482_v56 }
 0x310   :  { %v2401_v7 = vrot.slane %v2284_v63, %v3942_v32  ;;  %v2441_v29 = vrot.slane %v2314_v57, %v3942_v32  ;;  %v2484_v53 = vsel %vm2458_vm3, %v2437_v12, %v2483_v16 }
 0x312   :  { %v2476_v52 = vsel %vm2456_vm2, %v2401_v7, %v2475_v1  ;;  %v2485_v24 = vsel %vm2460_vm4, %v2441_v29, %v2484_v53 }
 0x313   :  { %v2287_v45 = vpop.permute.xlu1 %2286  ;;  %v2317_v49 = vpop.permute.xlu0 %2316 }
 0x314   :  { %v2405_v4 = vrot.slane %v2287_v45, %v3942_v32  ;;  %v2445_v42 = vrot.slane %v2317_v49, %v3942_v32 }
 0x316   :  { %v2477_v39 = vsel %vm2458_vm3, %v2405_v4, %v2476_v52  ;;  %v2486_v10 = vsel %vm2462_vm5, %v2445_v42, %v2485_v24 }
 0x317   :  { %v2290_v22 = vpop.permute.xlu1 %2289  ;;  %v2296_v14 = vpop.permute.xlu0 %2295 }
 0x318   :  { %v2409_v21 = vrot.slane %v2290_v22, %v3942_v32  ;;  %v2417_v35 = vrot.slane %v2296_v14, %v3942_v32 }
 0x31a   :  { %v2478_v36 = vsel %vm2460_vm4, %v2409_v21, %v2477_v39 }
 0x31b   :  { %v2293_v13 = vpop.permute.xlu1 %2292  ;;  %v2275_v28 = vpop.permute.xlu0 %2274 }
 0x31c   :  { %v2389_v41 = vrot.slane %v2275_v28, %v3942_v32  ;;  %v2413_v20 = vrot.slane %v2293_v13, %v3942_v32 }
 0x31e   :  { %v2479_v38 = vsel %vm2462_vm5, %v2413_v20, %v2478_v36 }
 0x31f   :  { %v2272_v15 = vpop.permute.xlu1 %2271  ;;  %v2323_v59 = vpop.permute.xlu0 %2322  ;;  %v2480_v31 = vsel %vm2464_vm6, %v2417_v35, %v2479_v38 }
 0x320   :  { %v2385_v3 = vrot.slane %v2272_v15, %v3942_v32  ;;  %v2453_v46 = vrot.slane %v2323_v59, %v3942_v32 }
 0x322   :  { %v2473_v18 = vsel %vm2464_vm6, %v2385_v3, %v2472_v5 }
 0x323   :  { %v2474_v48 = vsel %vm2466_vm7, %v2389_v41, %v2473_v18  ;;  %v2320_v60 = vpop.permute.xlu1 %2319 }
 0x324   :  { %2495 = vst.msk [vmem:[%s4022_s2 + $0x8] sm:$0xff] %vm2493_vm8, %v2474_v48  ;;  %v2449_v61 = vrot.slane %v2320_v60, %v3942_v32 }
 0x326   :  { %v2487_v27 = vsel %vm2464_vm6, %v2449_v61, %v2486_v10 }
 0x327   :  { %v2488_v47 = vsel %vm2466_vm7, %v2453_v46, %v2487_v27  ;;  %v2299_v37 = vpop.permute.xlu1 %2298 }
 0x328   :  { %2497 = vst.msk [vmem:[%s4022_s2 + $0x18] sm:$0xff] %vm2493_vm8, %v2488_v47  ;;  %v2421_v50 = vrot.slane %v2299_v37, %v3942_v32 }
 0x32a   :  { %v2481_v55 = vsel %vm2466_vm7, %v2421_v50, %v2480_v31 }
 0x32b   :  { %2496 = vst.msk [vmem:[%s4022_s2 + $0x10] sm:$0xff] %vm2493_vm8, %v2481_v55 }

</bundles_post_ra>
